<compile_context>
chip_gen: v7x
topology: tpu7x:2x2x1
jax: 0.10.0
libtpu: 0.0.40
codegen_flags: <defaults>
</compile_context>

<pallas_src>
import functools

import jax
import jax.numpy as jnp
import numpy as np
from jax import lax
from jax.experimental import pallas as pl
from jax.experimental.pallas import tpu as pltpu


def _spd_fused_kernel(x_ref, bias_ref, mask_ref, wcol_ref, out_ref, att_ref,
                      *, B, C, k, p, H, W):
    """Fused SPDAttention forward on a sublane-packed (B*C, H*W) slab.

    x_ref:    (B*C, H*W)           un-padded input, H*W on the lane axis
    bias_ref: (B*C, H*W)           precomputed diagonal-padding conv contribution
    mask_ref: (k*k, H*W)           0/1 validity per tap (zero-pad of x contribution)
    wcol_ref: (B*C, k*k*(2C-1))    per-(tap, channel-offset) weight columns
    out_ref / att_ref: (B*C, H*W)  output = att * x,  att = exp(conv - max(conv))
    """
    HW = H * W
    BC = B * C

    x = x_ref[...]                      # (B*C, HW)
    masks = mask_ref[...]               # (k*k, HW)
    wcol = wcol_ref[...]                # (B*C, k*k*(2C-1))
    acc = bias_ref[...]                 # conv accumulator, starts at padding bias

    col = 0
    for dy in range(k):
        for dx in range(k):
            off = (dy - p) * W + (dx - p)          # flat spatial offset of this tap
            t = dy * k + dx
            if off == 0:
                rolled = x                          # center tap: always in bounds
            else:
                # lane rotation (XLU) + validity mask (VPU); row-wrap garbage is
                # zeroed by the mask, exactly as in the validated two-pass kernel.
                rolled = pltpu.roll(x, shift=(-off) % HW, axis=1) * masks[t:t + 1, :]
            # Channel mixing: output row r = b*C+o needs input row r + delta
            # (delta = i - o).  A circular sublane roll aligns that row under r;
            # any wrap across a batch block or out of [0, C) carries weight 0 in
            # the precomputed column, so the circular wrap is harmless.
            for delta in range(-(C - 1), C):
                if delta == 0:
                    src = rolled
                else:
                    src = pltpu.roll(rolled, shift=(-delta) % BC, axis=0)
                acc = acc + wcol[:, col:col + 1] * src      # per-row scale FMA
                col += 1

    m = jnp.max(acc)                    # global max over all (B, C, H, W)
    att = jnp.exp(acc - m)              # EUP
    att_ref[...] = att
    out_ref[...] = att * x


@functools.partial(jax.jit, static_argnames=("epsilon", "padding_num"))
def spd_attention_forward(x, v, *, epsilon=1e-3, padding_num=1e-4):
    """SPDAttention.forward.  x: (B, C, H, W) NCHW.  v: (C, C, k, k).
    Returns (output, weight), both (B, C, H, W) float32 (NCHW, like PyTorch)."""
    x = x.astype(jnp.float32)
    B, C, H, W = x.shape
    O, I, kh, kw = v.shape
    assert O == C and I == C and kh == kw, "SPDAttention: out==in channels, square kernel"
    k = kh
    p = (k - 1) // 2
    Hp, Wp = H + 2 * p, W + 2 * p
    assert Hp == Wp, "SPDConv diagonal padding assumes square spatial dims"
    HW = H * W
    kk = k * k
    BC = B * C

    # --- parameter glue: SPD weight  w[o,i] = v[o,i]^T @ v[o,i] + eps*I ---
    v32 = v.astype(jnp.float32)
    w_spd = (jnp.einsum('oiab,oiac->oibc', v32, v32)
             + jnp.float32(epsilon) * jnp.eye(k, dtype=jnp.float32))      # (C, C, k, k)

    # --- glue: data-independent bias from the diagonal-padding border ---
    # xpad = border(diag*padding_num) + embed(x); conv(border) is batch/data free.
    pad_border = jnp.eye(Wp, dtype=jnp.float32) * jnp.float32(padding_num)
    pad_border = pad_border.at[p:Hp - p, p:Wp - p].set(0.0)    # interior overwritten by x
    patches = jnp.stack([pad_border[dy:dy + H, dx:dx + W]
                         for dy in range(k) for dx in range(k)], axis=0)  # (k*k, H, W)
    w_sum = jnp.sum(w_spd, axis=1).reshape(C, kk)              # padding equal over in-chans
    bias = jnp.einsum('ot,tyx->oyx', w_sum, patches).reshape(C, HW)       # (C, H*W)
    bias_bc = jnp.tile(bias, (B, 1))                                      # (B*C, H*W)

    # --- glue: per-tap validity masks (zero-padding of the x contribution) ---
    ys = np.arange(H)[:, None]
    xs = np.arange(W)[None, :]
    mask_np = np.stack([((ys + dy - p >= 0) & (ys + dy - p < H)
                         & (xs + dx - p >= 0) & (xs + dx - p < W)).reshape(HW)
                        for dy in range(k) for dx in range(k)], axis=0)
    masks = jnp.asarray(mask_np.astype(np.float32))                        # (k*k, H*W)

    # --- glue: per-(tap, channel-offset) weight columns, tiled over batch ---
    # column order must match the kernel's (dy, dx, delta) loop nest.
    o_idx = np.arange(C)
    cols = []
    for dy in range(k):
        for dx in range(k):
            for delta in range(-(C - 1), C):
                i_idx = o_idx + delta
                valid = jnp.asarray(((i_idx >= 0) & (i_idx < C)).astype(np.float32))
                i_cl = np.clip(i_idx, 0, C - 1)
                cols.append(w_spd[o_idx, i_cl, dy, dx] * valid)            # (C,)
    wcol = jnp.tile(jnp.stack(cols, axis=1), (B, 1))           # (B*C, k*k*(2C-1))

    x_flat = x.reshape(BC, HW)          # batch packed into sublanes, lane-dense H*W

    out_flat, att_flat = pl.pallas_call(
        functools.partial(_spd_fused_kernel, B=B, C=C, k=k, p=p, H=H, W=W),
        out_shape=(jax.ShapeDtypeStruct((BC, HW), jnp.float32),
                   jax.ShapeDtypeStruct((BC, HW), jnp.float32)),
    )(x_flat, bias_bc, masks, wcol)

    return out_flat.reshape(B, C, H, W), att_flat.reshape(B, C, H, W)


def _xavier_uniform(key, shape):
    # Matches torch.nn.init.xavier_uniform_ for a (O, I, kh, kw) conv weight.
    fan_out = shape[0] * shape[2] * shape[3]
    fan_in = shape[1] * shape[2] * shape[3]
    bound = float(np.sqrt(6.0 / (fan_in + fan_out)))
    return jax.random.uniform(key, shape, jnp.float32, -bound, bound)


def _reference(x, v, epsilon=1e-3, padding_num=1e-4):
    # Pure-JAX reference of SPDAttention.forward for validation.
    B, C, H, W = x.shape
    k = v.shape[-1]
    p = (k - 1) // 2
    w_spd = jnp.einsum('oiab,oiac->oibc', v, v) + epsilon * jnp.eye(k, dtype=jnp.float32)
    Hp, Wp = H + 2 * p, W + 2 * p
    xpad = jnp.broadcast_to(jnp.eye(Wp, dtype=jnp.float32) * padding_num, (B, C, Hp, Wp))
    xpad = xpad.at[:, :, p:Hp - p, p:Wp - p].set(x)
    conv = lax.conv_general_dilated(
        xpad, w_spd, window_strides=(1, 1), padding='VALID',
        dimension_numbers=('NCHW', 'OIHW', 'NCHW'),
        precision=lax.Precision.HIGHEST)
    att = jnp.exp(conv - jnp.max(conv))
    return att * x, att


if __name__ == "__main__":
    key = jax.random.PRNGKey(0)
    kx, kv = jax.random.split(key)

    B, C, H, W = 2, 4, 16, 16
    ksize = 3

    x = jax.random.normal(kx, (B, C, H, W), dtype=jnp.float32)
    v = _xavier_uniform(kv, (C, C, ksize, ksize))  # deterministic synthetic parameter

    out, att = spd_attention_forward(x, v)
    jax.block_until_ready((out, att))

    ref_out, ref_att = _reference(x, v)
    assert out.shape == (B, C, H, W) and att.shape == (B, C, H, W)
    assert np.allclose(np.asarray(att), np.asarray(ref_att), atol=1e-3, rtol=1e-3), \
        "attention weight mismatch vs reference"
    assert np.allclose(np.asarray(out), np.asarray(ref_out), atol=1e-3, rtol=1e-3), \
        "output mismatch vs reference"

    print("KERNEL_OK")
</pallas_src>

<mosaic_0001>
module attributes {stable_mosaic.version = 11 : i64} {
  func.func @_spd_fused_kernel(%arg0: memref<8x256xf32, #tpu.memory_space<vmem>>, %arg1: memref<8x256xf32, #tpu.memory_space<vmem>>, %arg2: memref<9x256xf32, #tpu.memory_space<vmem>>, %arg3: memref<8x63xf32, #tpu.memory_space<vmem>>, %arg4: memref<8x256xf32, #tpu.memory_space<vmem>>, %arg5: memref<8x256xf32, #tpu.memory_space<vmem>>) attributes {dimension_semantics = [], scalar_prefetch = 0 : i64, scratch_operands = 0 : i64, tpu.core_type = #tpu.core_type<tc>} {
    %c0 = arith.constant 0 : index
    %c0_0 = arith.constant 0 : index
    %0 = vector.load %arg0[%c0, %c0_0] : memref<8x256xf32, #tpu.memory_space<vmem>>, vector<8x256xf32>
    %c0_1 = arith.constant 0 : index
    %c0_2 = arith.constant 0 : index
    %1 = vector.load %arg2[%c0_1, %c0_2] : memref<9x256xf32, #tpu.memory_space<vmem>>, vector<9x256xf32>
    %c0_3 = arith.constant 0 : index
    %c0_4 = arith.constant 0 : index
    %2 = vector.load %arg3[%c0_3, %c0_4] : memref<8x63xf32, #tpu.memory_space<vmem>>, vector<8x63xf32>
    %c0_5 = arith.constant 0 : index
    %c0_6 = arith.constant 0 : index
    %3 = vector.load %arg1[%c0_5, %c0_6] : memref<8x256xf32, #tpu.memory_space<vmem>>, vector<8x256xf32>
    %c17_i32 = arith.constant 17 : i32
    %4 = tpu.dynamic_rotate %0 by %c17_i32 dim 1 : vector<8x256xf32>, i32 -> vector<8x256xf32>
    %5 = vector.extract_strided_slice %1 {offsets = [0, 0], sizes = [1, 256], strides = [1, 1]} : vector<9x256xf32> to vector<1x256xf32>
    %6 = vector.broadcast %5 : vector<1x256xf32> to vector<8x256xf32>
    %7 = arith.mulf %4, %6 : vector<8x256xf32>
    %c3_i32 = arith.constant 3 : i32
    %8 = tpu.dynamic_rotate %7 by %c3_i32 dim 0 : vector<8x256xf32>, i32 -> vector<8x256xf32>
    %9 = vector.extract_strided_slice %2 {offsets = [0, 0], sizes = [8, 1], strides = [1, 1]} : vector<8x63xf32> to vector<8x1xf32>
    %10 = vector.broadcast %9 : vector<8x1xf32> to vector<8x256xf32>
    %11 = arith.mulf %10, %8 : vector<8x256xf32>
    %12 = arith.addf %3, %11 : vector<8x256xf32>
    %c2_i32 = arith.constant 2 : i32
    %13 = tpu.dynamic_rotate %7 by %c2_i32 dim 0 : vector<8x256xf32>, i32 -> vector<8x256xf32>
    %14 = vector.extract_strided_slice %2 {offsets = [0, 1], sizes = [8, 1], strides = [1, 1]} : vector<8x63xf32> to vector<8x1xf32>
    %15 = vector.broadcast %14 : vector<8x1xf32> to vector<8x256xf32>
    %16 = arith.mulf %15, %13 : vector<8x256xf32>
    %17 = arith.addf %12, %16 : vector<8x256xf32>
    %c1_i32 = arith.constant 1 : i32
    %18 = tpu.dynamic_rotate %7 by %c1_i32 dim 0 : vector<8x256xf32>, i32 -> vector<8x256xf32>
    %19 = vector.extract_strided_slice %2 {offsets = [0, 2], sizes = [8, 1], strides = [1, 1]} : vector<8x63xf32> to vector<8x1xf32>
    %20 = vector.broadcast %19 : vector<8x1xf32> to vector<8x256xf32>
    %21 = arith.mulf %20, %18 : vector<8x256xf32>
    %22 = arith.addf %17, %21 : vector<8x256xf32>
    %23 = vector.extract_strided_slice %2 {offsets = [0, 3], sizes = [8, 1], strides = [1, 1]} : vector<8x63xf32> to vector<8x1xf32>
    %24 = vector.broadcast %23 : vector<8x1xf32> to vector<8x256xf32>
    %25 = arith.mulf %24, %7 : vector<8x256xf32>
    %26 = arith.addf %22, %25 : vector<8x256xf32>
    %c7_i32 = arith.constant 7 : i32
    %27 = tpu.dynamic_rotate %7 by %c7_i32 dim 0 : vector<8x256xf32>, i32 -> vector<8x256xf32>
    %28 = vector.extract_strided_slice %2 {offsets = [0, 4], sizes = [8, 1], strides = [1, 1]} : vector<8x63xf32> to vector<8x1xf32>
    %29 = vector.broadcast %28 : vector<8x1xf32> to vector<8x256xf32>
    %30 = arith.mulf %29, %27 : vector<8x256xf32>
    %31 = arith.addf %26, %30 : vector<8x256xf32>
    %c6_i32 = arith.constant 6 : i32
    %32 = tpu.dynamic_rotate %7 by %c6_i32 dim 0 : vector<8x256xf32>, i32 -> vector<8x256xf32>
    %33 = vector.extract_strided_slice %2 {offsets = [0, 5], sizes = [8, 1], strides = [1, 1]} : vector<8x63xf32> to vector<8x1xf32>
    %34 = vector.broadcast %33 : vector<8x1xf32> to vector<8x256xf32>
    %35 = arith.mulf %34, %32 : vector<8x256xf32>
    %36 = arith.addf %31, %35 : vector<8x256xf32>
    %c5_i32 = arith.constant 5 : i32
    %37 = tpu.dynamic_rotate %7 by %c5_i32 dim 0 : vector<8x256xf32>, i32 -> vector<8x256xf32>
    %38 = vector.extract_strided_slice %2 {offsets = [0, 6], sizes = [8, 1], strides = [1, 1]} : vector<8x63xf32> to vector<8x1xf32>
    %39 = vector.broadcast %38 : vector<8x1xf32> to vector<8x256xf32>
    %40 = arith.mulf %39, %37 : vector<8x256xf32>
    %41 = arith.addf %36, %40 : vector<8x256xf32>
    %c16_i32 = arith.constant 16 : i32
    %42 = tpu.dynamic_rotate %0 by %c16_i32 dim 1 : vector<8x256xf32>, i32 -> vector<8x256xf32>
    %43 = vector.extract_strided_slice %1 {offsets = [1, 0], sizes = [1, 256], strides = [1, 1]} : vector<9x256xf32> to vector<1x256xf32>
    %44 = vector.broadcast %43 : vector<1x256xf32> to vector<8x256xf32>
    %45 = arith.mulf %42, %44 : vector<8x256xf32>
    %c3_i32_7 = arith.constant 3 : i32
    %46 = tpu.dynamic_rotate %45 by %c3_i32_7 dim 0 : vector<8x256xf32>, i32 -> vector<8x256xf32>
    %47 = vector.extract_strided_slice %2 {offsets = [0, 7], sizes = [8, 1], strides = [1, 1]} : vector<8x63xf32> to vector<8x1xf32>
    %48 = vector.broadcast %47 : vector<8x1xf32> to vector<8x256xf32>
    %49 = arith.mulf %48, %46 : vector<8x256xf32>
    %50 = arith.addf %41, %49 : vector<8x256xf32>
    %c2_i32_8 = arith.constant 2 : i32
    %51 = tpu.dynamic_rotate %45 by %c2_i32_8 dim 0 : vector<8x256xf32>, i32 -> vector<8x256xf32>
    %52 = vector.extract_strided_slice %2 {offsets = [0, 8], sizes = [8, 1], strides = [1, 1]} : vector<8x63xf32> to vector<8x1xf32>
    %53 = vector.broadcast %52 : vector<8x1xf32> to vector<8x256xf32>
    %54 = arith.mulf %53, %51 : vector<8x256xf32>
    %55 = arith.addf %50, %54 : vector<8x256xf32>
    %c1_i32_9 = arith.constant 1 : i32
    %56 = tpu.dynamic_rotate %45 by %c1_i32_9 dim 0 : vector<8x256xf32>, i32 -> vector<8x256xf32>
    %57 = vector.extract_strided_slice %2 {offsets = [0, 9], sizes = [8, 1], strides = [1, 1]} : vector<8x63xf32> to vector<8x1xf32>
    %58 = vector.broadcast %57 : vector<8x1xf32> to vector<8x256xf32>
    %59 = arith.mulf %58, %56 : vector<8x256xf32>
    %60 = arith.addf %55, %59 : vector<8x256xf32>
    %61 = vector.extract_strided_slice %2 {offsets = [0, 10], sizes = [8, 1], strides = [1, 1]} : vector<8x63xf32> to vector<8x1xf32>
    %62 = vector.broadcast %61 : vector<8x1xf32> to vector<8x256xf32>
    %63 = arith.mulf %62, %45 : vector<8x256xf32>
    %64 = arith.addf %60, %63 : vector<8x256xf32>
    %c7_i32_10 = arith.constant 7 : i32
    %65 = tpu.dynamic_rotate %45 by %c7_i32_10 dim 0 : vector<8x256xf32>, i32 -> vector<8x256xf32>
    %66 = vector.extract_strided_slice %2 {offsets = [0, 11], sizes = [8, 1], strides = [1, 1]} : vector<8x63xf32> to vector<8x1xf32>
    %67 = vector.broadcast %66 : vector<8x1xf32> to vector<8x256xf32>
    %68 = arith.mulf %67, %65 : vector<8x256xf32>
    %69 = arith.addf %64, %68 : vector<8x256xf32>
    %c6_i32_11 = arith.constant 6 : i32
    %70 = tpu.dynamic_rotate %45 by %c6_i32_11 dim 0 : vector<8x256xf32>, i32 -> vector<8x256xf32>
    %71 = vector.extract_strided_slice %2 {offsets = [0, 12], sizes = [8, 1], strides = [1, 1]} : vector<8x63xf32> to vector<8x1xf32>
    %72 = vector.broadcast %71 : vector<8x1xf32> to vector<8x256xf32>
    %73 = arith.mulf %72, %70 : vector<8x256xf32>
    %74 = arith.addf %69, %73 : vector<8x256xf32>
    %c5_i32_12 = arith.constant 5 : i32
    %75 = tpu.dynamic_rotate %45 by %c5_i32_12 dim 0 : vector<8x256xf32>, i32 -> vector<8x256xf32>
    %76 = vector.extract_strided_slice %2 {offsets = [0, 13], sizes = [8, 1], strides = [1, 1]} : vector<8x63xf32> to vector<8x1xf32>
    %77 = vector.broadcast %76 : vector<8x1xf32> to vector<8x256xf32>
    %78 = arith.mulf %77, %75 : vector<8x256xf32>
    %79 = arith.addf %74, %78 : vector<8x256xf32>
    %c15_i32 = arith.constant 15 : i32
    %80 = tpu.dynamic_rotate %0 by %c15_i32 dim 1 : vector<8x256xf32>, i32 -> vector<8x256xf32>
    %81 = vector.extract_strided_slice %1 {offsets = [2, 0], sizes = [1, 256], strides = [1, 1]} : vector<9x256xf32> to vector<1x256xf32>
    %82 = vector.broadcast %81 : vector<1x256xf32> to vector<8x256xf32>
    %83 = arith.mulf %80, %82 : vector<8x256xf32>
    %c3_i32_13 = arith.constant 3 : i32
    %84 = tpu.dynamic_rotate %83 by %c3_i32_13 dim 0 : vector<8x256xf32>, i32 -> vector<8x256xf32>
    %85 = vector.extract_strided_slice %2 {offsets = [0, 14], sizes = [8, 1], strides = [1, 1]} : vector<8x63xf32> to vector<8x1xf32>
    %86 = vector.broadcast %85 : vector<8x1xf32> to vector<8x256xf32>
    %87 = arith.mulf %86, %84 : vector<8x256xf32>
    %88 = arith.addf %79, %87 : vector<8x256xf32>
    %c2_i32_14 = arith.constant 2 : i32
    %89 = tpu.dynamic_rotate %83 by %c2_i32_14 dim 0 : vector<8x256xf32>, i32 -> vector<8x256xf32>
    %90 = vector.extract_strided_slice %2 {offsets = [0, 15], sizes = [8, 1], strides = [1, 1]} : vector<8x63xf32> to vector<8x1xf32>
    %91 = vector.broadcast %90 : vector<8x1xf32> to vector<8x256xf32>
    %92 = arith.mulf %91, %89 : vector<8x256xf32>
    %93 = arith.addf %88, %92 : vector<8x256xf32>
    %c1_i32_15 = arith.constant 1 : i32
    %94 = tpu.dynamic_rotate %83 by %c1_i32_15 dim 0 : vector<8x256xf32>, i32 -> vector<8x256xf32>
    %95 = vector.extract_strided_slice %2 {offsets = [0, 16], sizes = [8, 1], strides = [1, 1]} : vector<8x63xf32> to vector<8x1xf32>
    %96 = vector.broadcast %95 : vector<8x1xf32> to vector<8x256xf32>
    %97 = arith.mulf %96, %94 : vector<8x256xf32>
    %98 = arith.addf %93, %97 : vector<8x256xf32>
    %99 = vector.extract_strided_slice %2 {offsets = [0, 17], sizes = [8, 1], strides = [1, 1]} : vector<8x63xf32> to vector<8x1xf32>
    %100 = vector.broadcast %99 : vector<8x1xf32> to vector<8x256xf32>
    %101 = arith.mulf %100, %83 : vector<8x256xf32>
    %102 = arith.addf %98, %101 : vector<8x256xf32>
    %c7_i32_16 = arith.constant 7 : i32
    %103 = tpu.dynamic_rotate %83 by %c7_i32_16 dim 0 : vector<8x256xf32>, i32 -> vector<8x256xf32>
    %104 = vector.extract_strided_slice %2 {offsets = [0, 18], sizes = [8, 1], strides = [1, 1]} : vector<8x63xf32> to vector<8x1xf32>
    %105 = vector.broadcast %104 : vector<8x1xf32> to vector<8x256xf32>
    %106 = arith.mulf %105, %103 : vector<8x256xf32>
    %107 = arith.addf %102, %106 : vector<8x256xf32>
    %c6_i32_17 = arith.constant 6 : i32
    %108 = tpu.dynamic_rotate %83 by %c6_i32_17 dim 0 : vector<8x256xf32>, i32 -> vector<8x256xf32>
    %109 = vector.extract_strided_slice %2 {offsets = [0, 19], sizes = [8, 1], strides = [1, 1]} : vector<8x63xf32> to vector<8x1xf32>
    %110 = vector.broadcast %109 : vector<8x1xf32> to vector<8x256xf32>
    %111 = arith.mulf %110, %108 : vector<8x256xf32>
    %112 = arith.addf %107, %111 : vector<8x256xf32>
    %c5_i32_18 = arith.constant 5 : i32
    %113 = tpu.dynamic_rotate %83 by %c5_i32_18 dim 0 : vector<8x256xf32>, i32 -> vector<8x256xf32>
    %114 = vector.extract_strided_slice %2 {offsets = [0, 20], sizes = [8, 1], strides = [1, 1]} : vector<8x63xf32> to vector<8x1xf32>
    %115 = vector.broadcast %114 : vector<8x1xf32> to vector<8x256xf32>
    %116 = arith.mulf %115, %113 : vector<8x256xf32>
    %117 = arith.addf %112, %116 : vector<8x256xf32>
    %c1_i32_19 = arith.constant 1 : i32
    %118 = tpu.dynamic_rotate %0 by %c1_i32_19 dim 1 : vector<8x256xf32>, i32 -> vector<8x256xf32>
    %119 = vector.extract_strided_slice %1 {offsets = [3, 0], sizes = [1, 256], strides = [1, 1]} : vector<9x256xf32> to vector<1x256xf32>
    %120 = vector.broadcast %119 : vector<1x256xf32> to vector<8x256xf32>
    %121 = arith.mulf %118, %120 : vector<8x256xf32>
    %c3_i32_20 = arith.constant 3 : i32
    %122 = tpu.dynamic_rotate %121 by %c3_i32_20 dim 0 : vector<8x256xf32>, i32 -> vector<8x256xf32>
    %123 = vector.extract_strided_slice %2 {offsets = [0, 21], sizes = [8, 1], strides = [1, 1]} : vector<8x63xf32> to vector<8x1xf32>
    %124 = vector.broadcast %123 : vector<8x1xf32> to vector<8x256xf32>
    %125 = arith.mulf %124, %122 : vector<8x256xf32>
    %126 = arith.addf %117, %125 : vector<8x256xf32>
    %c2_i32_21 = arith.constant 2 : i32
    %127 = tpu.dynamic_rotate %121 by %c2_i32_21 dim 0 : vector<8x256xf32>, i32 -> vector<8x256xf32>
    %128 = vector.extract_strided_slice %2 {offsets = [0, 22], sizes = [8, 1], strides = [1, 1]} : vector<8x63xf32> to vector<8x1xf32>
    %129 = vector.broadcast %128 : vector<8x1xf32> to vector<8x256xf32>
    %130 = arith.mulf %129, %127 : vector<8x256xf32>
    %131 = arith.addf %126, %130 : vector<8x256xf32>
    %c1_i32_22 = arith.constant 1 : i32
    %132 = tpu.dynamic_rotate %121 by %c1_i32_22 dim 0 : vector<8x256xf32>, i32 -> vector<8x256xf32>
    %133 = vector.extract_strided_slice %2 {offsets = [0, 23], sizes = [8, 1], strides = [1, 1]} : vector<8x63xf32> to vector<8x1xf32>
    %134 = vector.broadcast %133 : vector<8x1xf32> to vector<8x256xf32>
    %135 = arith.mulf %134, %132 : vector<8x256xf32>
    %136 = arith.addf %131, %135 : vector<8x256xf32>
    %137 = vector.extract_strided_slice %2 {offsets = [0, 24], sizes = [8, 1], strides = [1, 1]} : vector<8x63xf32> to vector<8x1xf32>
    %138 = vector.broadcast %137 : vector<8x1xf32> to vector<8x256xf32>
    %139 = arith.mulf %138, %121 : vector<8x256xf32>
    %140 = arith.addf %136, %139 : vector<8x256xf32>
    %c7_i32_23 = arith.constant 7 : i32
    %141 = tpu.dynamic_rotate %121 by %c7_i32_23 dim 0 : vector<8x256xf32>, i32 -> vector<8x256xf32>
    %142 = vector.extract_strided_slice %2 {offsets = [0, 25], sizes = [8, 1], strides = [1, 1]} : vector<8x63xf32> to vector<8x1xf32>
    %143 = vector.broadcast %142 : vector<8x1xf32> to vector<8x256xf32>
    %144 = arith.mulf %143, %141 : vector<8x256xf32>
    %145 = arith.addf %140, %144 : vector<8x256xf32>
    %c6_i32_24 = arith.constant 6 : i32
    %146 = tpu.dynamic_rotate %121 by %c6_i32_24 dim 0 : vector<8x256xf32>, i32 -> vector<8x256xf32>
    %147 = vector.extract_strided_slice %2 {offsets = [0, 26], sizes = [8, 1], strides = [1, 1]} : vector<8x63xf32> to vector<8x1xf32>
    %148 = vector.broadcast %147 : vector<8x1xf32> to vector<8x256xf32>
    %149 = arith.mulf %148, %146 : vector<8x256xf32>
    %150 = arith.addf %145, %149 : vector<8x256xf32>
    %c5_i32_25 = arith.constant 5 : i32
    %151 = tpu.dynamic_rotate %121 by %c5_i32_25 dim 0 : vector<8x256xf32>, i32 -> vector<8x256xf32>
    %152 = vector.extract_strided_slice %2 {offsets = [0, 27], sizes = [8, 1], strides = [1, 1]} : vector<8x63xf32> to vector<8x1xf32>
    %153 = vector.broadcast %152 : vector<8x1xf32> to vector<8x256xf32>
    %154 = arith.mulf %153, %151 : vector<8x256xf32>
    %155 = arith.addf %150, %154 : vector<8x256xf32>
    %c3_i32_26 = arith.constant 3 : i32
    %156 = tpu.dynamic_rotate %0 by %c3_i32_26 dim 0 : vector<8x256xf32>, i32 -> vector<8x256xf32>
    %157 = vector.extract_strided_slice %2 {offsets = [0, 28], sizes = [8, 1], strides = [1, 1]} : vector<8x63xf32> to vector<8x1xf32>
    %158 = vector.broadcast %157 : vector<8x1xf32> to vector<8x256xf32>
    %159 = arith.mulf %158, %156 : vector<8x256xf32>
    %160 = arith.addf %155, %159 : vector<8x256xf32>
    %c2_i32_27 = arith.constant 2 : i32
    %161 = tpu.dynamic_rotate %0 by %c2_i32_27 dim 0 : vector<8x256xf32>, i32 -> vector<8x256xf32>
    %162 = vector.extract_strided_slice %2 {offsets = [0, 29], sizes = [8, 1], strides = [1, 1]} : vector<8x63xf32> to vector<8x1xf32>
    %163 = vector.broadcast %162 : vector<8x1xf32> to vector<8x256xf32>
    %164 = arith.mulf %163, %161 : vector<8x256xf32>
    %165 = arith.addf %160, %164 : vector<8x256xf32>
    %c1_i32_28 = arith.constant 1 : i32
    %166 = tpu.dynamic_rotate %0 by %c1_i32_28 dim 0 : vector<8x256xf32>, i32 -> vector<8x256xf32>
    %167 = vector.extract_strided_slice %2 {offsets = [0, 30], sizes = [8, 1], strides = [1, 1]} : vector<8x63xf32> to vector<8x1xf32>
    %168 = vector.broadcast %167 : vector<8x1xf32> to vector<8x256xf32>
    %169 = arith.mulf %168, %166 : vector<8x256xf32>
    %170 = arith.addf %165, %169 : vector<8x256xf32>
    %171 = vector.extract_strided_slice %2 {offsets = [0, 31], sizes = [8, 1], strides = [1, 1]} : vector<8x63xf32> to vector<8x1xf32>
    %172 = vector.broadcast %171 : vector<8x1xf32> to vector<8x256xf32>
    %173 = arith.mulf %172, %0 : vector<8x256xf32>
    %174 = arith.addf %170, %173 : vector<8x256xf32>
    %c7_i32_29 = arith.constant 7 : i32
    %175 = tpu.dynamic_rotate %0 by %c7_i32_29 dim 0 : vector<8x256xf32>, i32 -> vector<8x256xf32>
    %176 = vector.extract_strided_slice %2 {offsets = [0, 32], sizes = [8, 1], strides = [1, 1]} : vector<8x63xf32> to vector<8x1xf32>
    %177 = vector.broadcast %176 : vector<8x1xf32> to vector<8x256xf32>
    %178 = arith.mulf %177, %175 : vector<8x256xf32>
    %179 = arith.addf %174, %178 : vector<8x256xf32>
    %c6_i32_30 = arith.constant 6 : i32
    %180 = tpu.dynamic_rotate %0 by %c6_i32_30 dim 0 : vector<8x256xf32>, i32 -> vector<8x256xf32>
    %181 = vector.extract_strided_slice %2 {offsets = [0, 33], sizes = [8, 1], strides = [1, 1]} : vector<8x63xf32> to vector<8x1xf32>
    %182 = vector.broadcast %181 : vector<8x1xf32> to vector<8x256xf32>
    %183 = arith.mulf %182, %180 : vector<8x256xf32>
    %184 = arith.addf %179, %183 : vector<8x256xf32>
    %c5_i32_31 = arith.constant 5 : i32
    %185 = tpu.dynamic_rotate %0 by %c5_i32_31 dim 0 : vector<8x256xf32>, i32 -> vector<8x256xf32>
    %186 = vector.extract_strided_slice %2 {offsets = [0, 34], sizes = [8, 1], strides = [1, 1]} : vector<8x63xf32> to vector<8x1xf32>
    %187 = vector.broadcast %186 : vector<8x1xf32> to vector<8x256xf32>
    %188 = arith.mulf %187, %185 : vector<8x256xf32>
    %189 = arith.addf %184, %188 : vector<8x256xf32>
    %c255_i32 = arith.constant 255 : i32
    %190 = tpu.dynamic_rotate %0 by %c255_i32 dim 1 : vector<8x256xf32>, i32 -> vector<8x256xf32>
    %191 = vector.extract_strided_slice %1 {offsets = [5, 0], sizes = [1, 256], strides = [1, 1]} : vector<9x256xf32> to vector<1x256xf32>
    %192 = vector.broadcast %191 : vector<1x256xf32> to vector<8x256xf32>
    %193 = arith.mulf %190, %192 : vector<8x256xf32>
    %c3_i32_32 = arith.constant 3 : i32
    %194 = tpu.dynamic_rotate %193 by %c3_i32_32 dim 0 : vector<8x256xf32>, i32 -> vector<8x256xf32>
    %195 = vector.extract_strided_slice %2 {offsets = [0, 35], sizes = [8, 1], strides = [1, 1]} : vector<8x63xf32> to vector<8x1xf32>
    %196 = vector.broadcast %195 : vector<8x1xf32> to vector<8x256xf32>
    %197 = arith.mulf %196, %194 : vector<8x256xf32>
    %198 = arith.addf %189, %197 : vector<8x256xf32>
    %c2_i32_33 = arith.constant 2 : i32
    %199 = tpu.dynamic_rotate %193 by %c2_i32_33 dim 0 : vector<8x256xf32>, i32 -> vector<8x256xf32>
    %200 = vector.extract_strided_slice %2 {offsets = [0, 36], sizes = [8, 1], strides = [1, 1]} : vector<8x63xf32> to vector<8x1xf32>
    %201 = vector.broadcast %200 : vector<8x1xf32> to vector<8x256xf32>
    %202 = arith.mulf %201, %199 : vector<8x256xf32>
    %203 = arith.addf %198, %202 : vector<8x256xf32>
    %c1_i32_34 = arith.constant 1 : i32
    %204 = tpu.dynamic_rotate %193 by %c1_i32_34 dim 0 : vector<8x256xf32>, i32 -> vector<8x256xf32>
    %205 = vector.extract_strided_slice %2 {offsets = [0, 37], sizes = [8, 1], strides = [1, 1]} : vector<8x63xf32> to vector<8x1xf32>
    %206 = vector.broadcast %205 : vector<8x1xf32> to vector<8x256xf32>
    %207 = arith.mulf %206, %204 : vector<8x256xf32>
    %208 = arith.addf %203, %207 : vector<8x256xf32>
    %209 = vector.extract_strided_slice %2 {offsets = [0, 38], sizes = [8, 1], strides = [1, 1]} : vector<8x63xf32> to vector<8x1xf32>
    %210 = vector.broadcast %209 : vector<8x1xf32> to vector<8x256xf32>
    %211 = arith.mulf %210, %193 : vector<8x256xf32>
    %212 = arith.addf %208, %211 : vector<8x256xf32>
    %c7_i32_35 = arith.constant 7 : i32
    %213 = tpu.dynamic_rotate %193 by %c7_i32_35 dim 0 : vector<8x256xf32>, i32 -> vector<8x256xf32>
    %214 = vector.extract_strided_slice %2 {offsets = [0, 39], sizes = [8, 1], strides = [1, 1]} : vector<8x63xf32> to vector<8x1xf32>
    %215 = vector.broadcast %214 : vector<8x1xf32> to vector<8x256xf32>
    %216 = arith.mulf %215, %213 : vector<8x256xf32>
    %217 = arith.addf %212, %216 : vector<8x256xf32>
    %c6_i32_36 = arith.constant 6 : i32
    %218 = tpu.dynamic_rotate %193 by %c6_i32_36 dim 0 : vector<8x256xf32>, i32 -> vector<8x256xf32>
    %219 = vector.extract_strided_slice %2 {offsets = [0, 40], sizes = [8, 1], strides = [1, 1]} : vector<8x63xf32> to vector<8x1xf32>
    %220 = vector.broadcast %219 : vector<8x1xf32> to vector<8x256xf32>
    %221 = arith.mulf %220, %218 : vector<8x256xf32>
    %222 = arith.addf %217, %221 : vector<8x256xf32>
    %c5_i32_37 = arith.constant 5 : i32
    %223 = tpu.dynamic_rotate %193 by %c5_i32_37 dim 0 : vector<8x256xf32>, i32 -> vector<8x256xf32>
    %224 = vector.extract_strided_slice %2 {offsets = [0, 41], sizes = [8, 1], strides = [1, 1]} : vector<8x63xf32> to vector<8x1xf32>
    %225 = vector.broadcast %224 : vector<8x1xf32> to vector<8x256xf32>
    %226 = arith.mulf %225, %223 : vector<8x256xf32>
    %227 = arith.addf %222, %226 : vector<8x256xf32>
    %c241_i32 = arith.constant 241 : i32
    %228 = tpu.dynamic_rotate %0 by %c241_i32 dim 1 : vector<8x256xf32>, i32 -> vector<8x256xf32>
    %229 = vector.extract_strided_slice %1 {offsets = [6, 0], sizes = [1, 256], strides = [1, 1]} : vector<9x256xf32> to vector<1x256xf32>
    %230 = vector.broadcast %229 : vector<1x256xf32> to vector<8x256xf32>
    %231 = arith.mulf %228, %230 : vector<8x256xf32>
    %c3_i32_38 = arith.constant 3 : i32
    %232 = tpu.dynamic_rotate %231 by %c3_i32_38 dim 0 : vector<8x256xf32>, i32 -> vector<8x256xf32>
    %233 = vector.extract_strided_slice %2 {offsets = [0, 42], sizes = [8, 1], strides = [1, 1]} : vector<8x63xf32> to vector<8x1xf32>
    %234 = vector.broadcast %233 : vector<8x1xf32> to vector<8x256xf32>
    %235 = arith.mulf %234, %232 : vector<8x256xf32>
    %236 = arith.addf %227, %235 : vector<8x256xf32>
    %c2_i32_39 = arith.constant 2 : i32
    %237 = tpu.dynamic_rotate %231 by %c2_i32_39 dim 0 : vector<8x256xf32>, i32 -> vector<8x256xf32>
    %238 = vector.extract_strided_slice %2 {offsets = [0, 43], sizes = [8, 1], strides = [1, 1]} : vector<8x63xf32> to vector<8x1xf32>
    %239 = vector.broadcast %238 : vector<8x1xf32> to vector<8x256xf32>
    %240 = arith.mulf %239, %237 : vector<8x256xf32>
    %241 = arith.addf %236, %240 : vector<8x256xf32>
    %c1_i32_40 = arith.constant 1 : i32
    %242 = tpu.dynamic_rotate %231 by %c1_i32_40 dim 0 : vector<8x256xf32>, i32 -> vector<8x256xf32>
    %243 = vector.extract_strided_slice %2 {offsets = [0, 44], sizes = [8, 1], strides = [1, 1]} : vector<8x63xf32> to vector<8x1xf32>
    %244 = vector.broadcast %243 : vector<8x1xf32> to vector<8x256xf32>
    %245 = arith.mulf %244, %242 : vector<8x256xf32>
    %246 = arith.addf %241, %245 : vector<8x256xf32>
    %247 = vector.extract_strided_slice %2 {offsets = [0, 45], sizes = [8, 1], strides = [1, 1]} : vector<8x63xf32> to vector<8x1xf32>
    %248 = vector.broadcast %247 : vector<8x1xf32> to vector<8x256xf32>
    %249 = arith.mulf %248, %231 : vector<8x256xf32>
    %250 = arith.addf %246, %249 : vector<8x256xf32>
    %c7_i32_41 = arith.constant 7 : i32
    %251 = tpu.dynamic_rotate %231 by %c7_i32_41 dim 0 : vector<8x256xf32>, i32 -> vector<8x256xf32>
    %252 = vector.extract_strided_slice %2 {offsets = [0, 46], sizes = [8, 1], strides = [1, 1]} : vector<8x63xf32> to vector<8x1xf32>
    %253 = vector.broadcast %252 : vector<8x1xf32> to vector<8x256xf32>
    %254 = arith.mulf %253, %251 : vector<8x256xf32>
    %255 = arith.addf %250, %254 : vector<8x256xf32>
    %c6_i32_42 = arith.constant 6 : i32
    %256 = tpu.dynamic_rotate %231 by %c6_i32_42 dim 0 : vector<8x256xf32>, i32 -> vector<8x256xf32>
    %257 = vector.extract_strided_slice %2 {offsets = [0, 47], sizes = [8, 1], strides = [1, 1]} : vector<8x63xf32> to vector<8x1xf32>
    %258 = vector.broadcast %257 : vector<8x1xf32> to vector<8x256xf32>
    %259 = arith.mulf %258, %256 : vector<8x256xf32>
    %260 = arith.addf %255, %259 : vector<8x256xf32>
    %c5_i32_43 = arith.constant 5 : i32
    %261 = tpu.dynamic_rotate %231 by %c5_i32_43 dim 0 : vector<8x256xf32>, i32 -> vector<8x256xf32>
    %262 = vector.extract_strided_slice %2 {offsets = [0, 48], sizes = [8, 1], strides = [1, 1]} : vector<8x63xf32> to vector<8x1xf32>
    %263 = vector.broadcast %262 : vector<8x1xf32> to vector<8x256xf32>
    %264 = arith.mulf %263, %261 : vector<8x256xf32>
    %265 = arith.addf %260, %264 : vector<8x256xf32>
    %c240_i32 = arith.constant 240 : i32
    %266 = tpu.dynamic_rotate %0 by %c240_i32 dim 1 : vector<8x256xf32>, i32 -> vector<8x256xf32>
    %267 = vector.extract_strided_slice %1 {offsets = [7, 0], sizes = [1, 256], strides = [1, 1]} : vector<9x256xf32> to vector<1x256xf32>
    %268 = vector.broadcast %267 : vector<1x256xf32> to vector<8x256xf32>
    %269 = arith.mulf %266, %268 : vector<8x256xf32>
    %c3_i32_44 = arith.constant 3 : i32
    %270 = tpu.dynamic_rotate %269 by %c3_i32_44 dim 0 : vector<8x256xf32>, i32 -> vector<8x256xf32>
    %271 = vector.extract_strided_slice %2 {offsets = [0, 49], sizes = [8, 1], strides = [1, 1]} : vector<8x63xf32> to vector<8x1xf32>
    %272 = vector.broadcast %271 : vector<8x1xf32> to vector<8x256xf32>
    %273 = arith.mulf %272, %270 : vector<8x256xf32>
    %274 = arith.addf %265, %273 : vector<8x256xf32>
    %c2_i32_45 = arith.constant 2 : i32
    %275 = tpu.dynamic_rotate %269 by %c2_i32_45 dim 0 : vector<8x256xf32>, i32 -> vector<8x256xf32>
    %276 = vector.extract_strided_slice %2 {offsets = [0, 50], sizes = [8, 1], strides = [1, 1]} : vector<8x63xf32> to vector<8x1xf32>
    %277 = vector.broadcast %276 : vector<8x1xf32> to vector<8x256xf32>
    %278 = arith.mulf %277, %275 : vector<8x256xf32>
    %279 = arith.addf %274, %278 : vector<8x256xf32>
    %c1_i32_46 = arith.constant 1 : i32
    %280 = tpu.dynamic_rotate %269 by %c1_i32_46 dim 0 : vector<8x256xf32>, i32 -> vector<8x256xf32>
    %281 = vector.extract_strided_slice %2 {offsets = [0, 51], sizes = [8, 1], strides = [1, 1]} : vector<8x63xf32> to vector<8x1xf32>
    %282 = vector.broadcast %281 : vector<8x1xf32> to vector<8x256xf32>
    %283 = arith.mulf %282, %280 : vector<8x256xf32>
    %284 = arith.addf %279, %283 : vector<8x256xf32>
    %285 = vector.extract_strided_slice %2 {offsets = [0, 52], sizes = [8, 1], strides = [1, 1]} : vector<8x63xf32> to vector<8x1xf32>
    %286 = vector.broadcast %285 : vector<8x1xf32> to vector<8x256xf32>
    %287 = arith.mulf %286, %269 : vector<8x256xf32>
    %288 = arith.addf %284, %287 : vector<8x256xf32>
    %c7_i32_47 = arith.constant 7 : i32
    %289 = tpu.dynamic_rotate %269 by %c7_i32_47 dim 0 : vector<8x256xf32>, i32 -> vector<8x256xf32>
    %290 = vector.extract_strided_slice %2 {offsets = [0, 53], sizes = [8, 1], strides = [1, 1]} : vector<8x63xf32> to vector<8x1xf32>
    %291 = vector.broadcast %290 : vector<8x1xf32> to vector<8x256xf32>
    %292 = arith.mulf %291, %289 : vector<8x256xf32>
    %293 = arith.addf %288, %292 : vector<8x256xf32>
    %c6_i32_48 = arith.constant 6 : i32
    %294 = tpu.dynamic_rotate %269 by %c6_i32_48 dim 0 : vector<8x256xf32>, i32 -> vector<8x256xf32>
    %295 = vector.extract_strided_slice %2 {offsets = [0, 54], sizes = [8, 1], strides = [1, 1]} : vector<8x63xf32> to vector<8x1xf32>
    %296 = vector.broadcast %295 : vector<8x1xf32> to vector<8x256xf32>
    %297 = arith.mulf %296, %294 : vector<8x256xf32>
    %298 = arith.addf %293, %297 : vector<8x256xf32>
    %c5_i32_49 = arith.constant 5 : i32
    %299 = tpu.dynamic_rotate %269 by %c5_i32_49 dim 0 : vector<8x256xf32>, i32 -> vector<8x256xf32>
    %300 = vector.extract_strided_slice %2 {offsets = [0, 55], sizes = [8, 1], strides = [1, 1]} : vector<8x63xf32> to vector<8x1xf32>
    %301 = vector.broadcast %300 : vector<8x1xf32> to vector<8x256xf32>
    %302 = arith.mulf %301, %299 : vector<8x256xf32>
    %303 = arith.addf %298, %302 : vector<8x256xf32>
    %c239_i32 = arith.constant 239 : i32
    %304 = tpu.dynamic_rotate %0 by %c239_i32 dim 1 : vector<8x256xf32>, i32 -> vector<8x256xf32>
    %305 = vector.extract_strided_slice %1 {offsets = [8, 0], sizes = [1, 256], strides = [1, 1]} : vector<9x256xf32> to vector<1x256xf32>
    %306 = vector.broadcast %305 : vector<1x256xf32> to vector<8x256xf32>
    %307 = arith.mulf %304, %306 : vector<8x256xf32>
    %c3_i32_50 = arith.constant 3 : i32
    %308 = tpu.dynamic_rotate %307 by %c3_i32_50 dim 0 : vector<8x256xf32>, i32 -> vector<8x256xf32>
    %309 = vector.extract_strided_slice %2 {offsets = [0, 56], sizes = [8, 1], strides = [1, 1]} : vector<8x63xf32> to vector<8x1xf32>
    %310 = vector.broadcast %309 : vector<8x1xf32> to vector<8x256xf32>
    %311 = arith.mulf %310, %308 : vector<8x256xf32>
    %312 = arith.addf %303, %311 : vector<8x256xf32>
    %c2_i32_51 = arith.constant 2 : i32
    %313 = tpu.dynamic_rotate %307 by %c2_i32_51 dim 0 : vector<8x256xf32>, i32 -> vector<8x256xf32>
    %314 = vector.extract_strided_slice %2 {offsets = [0, 57], sizes = [8, 1], strides = [1, 1]} : vector<8x63xf32> to vector<8x1xf32>
    %315 = vector.broadcast %314 : vector<8x1xf32> to vector<8x256xf32>
    %316 = arith.mulf %315, %313 : vector<8x256xf32>
    %317 = arith.addf %312, %316 : vector<8x256xf32>
    %c1_i32_52 = arith.constant 1 : i32
    %318 = tpu.dynamic_rotate %307 by %c1_i32_52 dim 0 : vector<8x256xf32>, i32 -> vector<8x256xf32>
    %319 = vector.extract_strided_slice %2 {offsets = [0, 58], sizes = [8, 1], strides = [1, 1]} : vector<8x63xf32> to vector<8x1xf32>
    %320 = vector.broadcast %319 : vector<8x1xf32> to vector<8x256xf32>
    %321 = arith.mulf %320, %318 : vector<8x256xf32>
    %322 = arith.addf %317, %321 : vector<8x256xf32>
    %323 = vector.extract_strided_slice %2 {offsets = [0, 59], sizes = [8, 1], strides = [1, 1]} : vector<8x63xf32> to vector<8x1xf32>
    %324 = vector.broadcast %323 : vector<8x1xf32> to vector<8x256xf32>
    %325 = arith.mulf %324, %307 : vector<8x256xf32>
    %326 = arith.addf %322, %325 : vector<8x256xf32>
    %c7_i32_53 = arith.constant 7 : i32
    %327 = tpu.dynamic_rotate %307 by %c7_i32_53 dim 0 : vector<8x256xf32>, i32 -> vector<8x256xf32>
    %328 = vector.extract_strided_slice %2 {offsets = [0, 60], sizes = [8, 1], strides = [1, 1]} : vector<8x63xf32> to vector<8x1xf32>
    %329 = vector.broadcast %328 : vector<8x1xf32> to vector<8x256xf32>
    %330 = arith.mulf %329, %327 : vector<8x256xf32>
    %331 = arith.addf %326, %330 : vector<8x256xf32>
    %c6_i32_54 = arith.constant 6 : i32
    %332 = tpu.dynamic_rotate %307 by %c6_i32_54 dim 0 : vector<8x256xf32>, i32 -> vector<8x256xf32>
    %333 = vector.extract_strided_slice %2 {offsets = [0, 61], sizes = [8, 1], strides = [1, 1]} : vector<8x63xf32> to vector<8x1xf32>
    %334 = vector.broadcast %333 : vector<8x1xf32> to vector<8x256xf32>
    %335 = arith.mulf %334, %332 : vector<8x256xf32>
    %336 = arith.addf %331, %335 : vector<8x256xf32>
    %c5_i32_55 = arith.constant 5 : i32
    %337 = tpu.dynamic_rotate %307 by %c5_i32_55 dim 0 : vector<8x256xf32>, i32 -> vector<8x256xf32>
    %338 = vector.extract_strided_slice %2 {offsets = [0, 62], sizes = [8, 1], strides = [1, 1]} : vector<8x63xf32> to vector<8x1xf32>
    %339 = vector.broadcast %338 : vector<8x1xf32> to vector<8x256xf32>
    %340 = arith.mulf %339, %337 : vector<8x256xf32>
    %341 = arith.addf %336, %340 : vector<8x256xf32>
    %342 = vector.shape_cast %341 : vector<8x256xf32> to vector<1x8x256xf32>
    %cst = arith.constant dense<0xFF800000> : vector<1xf32>
    %343 = vector.multi_reduction <maximumf>, %342, %cst [1, 2] : vector<1x8x256xf32> to vector<1xf32>
    %344 = vector.shape_cast %343 : vector<1xf32> to vector<1x1x1xf32>
    %345 = vector.extract %344[0, 0, 0] : f32 from vector<1x1x1xf32>
    %346 = vector.broadcast %345 : f32 to vector<8x256xf32>
    %347 = arith.subf %341, %346 : vector<8x256xf32>
    %348 = math.exp %347 : vector<8x256xf32>
    %c0_56 = arith.constant 0 : index
    %c0_57 = arith.constant 0 : index
    %349 = vector.load %arg5[%c0_56, %c0_57] : memref<8x256xf32, #tpu.memory_space<vmem>>, vector<8x256xf32>
    tpu.vector_store %arg5[%c0_56, %c0_57], %348 {strides = array<i32>} : memref<8x256xf32, #tpu.memory_space<vmem>>, vector<8x256xf32>,
    %350 = arith.mulf %348, %0 : vector<8x256xf32>
    %c0_58 = arith.constant 0 : index
    %c0_59 = arith.constant 0 : index
    %351 = vector.load %arg4[%c0_58, %c0_59] : memref<8x256xf32, #tpu.memory_space<vmem>>, vector<8x256xf32>
    tpu.vector_store %arg4[%c0_58, %c0_59], %350 {strides = array<i32>} : memref<8x256xf32, #tpu.memory_space<vmem>>, vector<8x256xf32>,
    return
  }
}

</mosaic_0001>

<bundles_post_ra>
// kernel: tile.12
= control target key start
LH: loop header
LB: loop body
LE: loop exit
PB: predicated region body
PF: predicated region fallthrough
CT: control target
= control target key end

     0   :  { %s76_s0 = inlined_call_operand.vmem [shape: f32[2,4,256], index: 0, kind: input, shape index: {}]   ;;  %s77_s1 = inlined_call_operand.vmem [shape: f32[8,256], index: 1, kind: output, shape index: {}]  }
   0x1   :  { %v36_v0 = vld [vmem:[%s76_s0 + $0xc] sm:$0xf]  ;;  %v37_v1 = vld [vmem:[%s76_s0 + $0x8] sm:$0xf]  ;;  %v38_v2 = vld [vmem:[%s76_s0 + $0x4] sm:$0xf] }
   0x2   :  { %8 = vst [vmem:[#allocation0 + $0x18] sm:$0xf] %v36_v0  ;;  %13 = vst [vmem:[#allocation0 + $0x10] sm:$0xf] %v37_v1  ;;  %v18_v3 = vld [vmem:[%s76_s0] sm:$0xf] }
   0x3   :  { %17 = vst [vmem:[#allocation0 + $0x8] sm:$0xf] %v38_v2  ;;  %19 = vst [vmem:[#allocation0] sm:$0xf] %v18_v3 }
   0x9   :  { %v27_v5 = vld [vmem:[#allocation0 + $0x10] sm:$0xf]   ;;  %v31_v6 = vld [vmem:[#allocation0 + $0x18] sm:$0xf]  }
   0xa   :  { %v23_v4 = vld [vmem:[#allocation0 + $0x8] sm:$0xf]   ;;  %v20_v7 = vld [vmem:[#allocation0] sm:$0xf]   ;;  %40 = vst [vmem:[%s77_s1 + $0x4] sm:$0xf] %v27_v5  }
   0xb   :  { %39 = vst [vmem:[%s77_s1 + $0x8] sm:$0xf] %v23_v4   ;;  %41 = vst [vmem:[%s77_s1 + $0xc] sm:$0xf] %v31_v6  }
   0xc   :  { %21 = vst [vmem:[%s77_s1] sm:$0xf] %v20_v7  }

// kernel: spd_attention_forward.1
= control target key start
LH: loop header
LB: loop body
LE: loop exit
PB: predicated region body
PF: predicated region fallthrough
CT: control target
= control target key end

     0   :  { %v955_v0 = vmov 0   ;;  %v956_v3 = vmov 1   ;;  %s957_s22 = smov 17   ;;  %v958_v5 = vmov 2   ;;  %v959_v6 = vmov 3   ;;  %s976_s25 = smov 15   ;;  %s1337_s3 = inlined_call_operand.vmem [shape: f32[8,63], index: 3, kind: input, shape index: {}]   ;;  %s1338_s0 = inlined_call_operand.vmem [shape: f32[8,256], index: 0, kind: input, shape index: {}]   ;;  %s1339_s2 = inlined_call_operand.vmem [shape: f32[9,256], index: 2, kind: input, shape index: {}]   ;;  %s1340_s1 = inlined_call_operand.vmem [shape: f32[8,256], index: 1, kind: input, shape index: {}]   ;;  %s1341_s5 = inlined_call_operand.vmem [shape: f32[8,256], index: 5, kind: output, shape index: {1}]   ;;  %s1342_s4 = inlined_call_operand.vmem [shape: f32[8,256], index: 4, kind: output, shape index: {0}]  }
   0x1   :  { %885 = vset.pattern.permute.xlu0 %v955_v0  ;;  %v1059_v1 = vld [vmem:[%s1337_s3] sm:$0xff]  ;;  %v1064_v2 = vld [vmem:[%s1338_s0 + $0x8] sm:$0xff]  ;;  %886 = vset.pattern.permute.xlu1 %v956_v3  ;;  %v960_v7 = vmov 5   ;;  %v961_v8 = vmov 4   ;;  %s962_s3 = smov 16   ;;  %v963_v9 = vmov 6   ;;  %v32_v45 = vlaneseq }
   0x2   :  { %51 = vperm.xlu0 %885, %v1059_v1   ;;  %30 = vrot.lane.b32.xlu1 %v1064_v2, %s957_s22  ;;  %v1071_v4 = vld [vmem:[%s1338_s0] sm:$0xff]  ;;  %v964_v10 = vmov 8   ;;  %v965_v11 = vmov 7   ;;  %v966_v12 = vmov 11   ;;  %v967_v13 = vmov 9   ;;  %s985_s26 = smov 127  }
   0x3   :  { %v968_v14 = vmov 14   ;;  %v969_v15 = vmov 15   ;;  %v970_v16 = vmov 10   ;;  %v971_v17 = vmov 18   ;;  %s987_s27 = smov 1   ;;  %s990_s28 = smov 113  }
   0x4   :  { %v972_v18 = vmov 12   ;;  %v973_v19 = vmov 21   ;;  %v974_v20 = vmov 13   ;;  %v975_v21 = vmov 22   ;;  %v1136_v52 = vld [vmem:[%s1339_s2] sm:$0xff]  ;;  %v1141_v53 = vld [vmem:[%s1339_s2 + $0x8] sm:$0xff] }
   0x5   :  { %v977_v22 = vmov 16   ;;  %v978_v23 = vmov 25   ;;  %v979_v24 = vmov 28   ;;  %v980_v25 = vmov 17   ;;  %s1022_s12 = smov 111  }
   0x6   :  { %61 = vperm.xlu1 %886, %v1059_v1   ;;  %28 = vrot.lane.b32.xlu0 %v1071_v4, %s957_s22  ;;  %v981_v26 = vmov 31   ;;  %v982_v27 = vmov 19   ;;  %v983_v28 = vmov 34   ;;  %v984_v29 = vmov 20  }
   0x7   :  { %887 = vset.pattern.permute.xlu0 %v958_v5  ;;  %v986_v30 = vmov 37   ;;  %v988_v31 = vmov 23   ;;  %v989_v32 = vmov 40   ;;  %v991_v33 = vmov 43  }
   0x8   :  { %v992_v34 = vmov 24   ;;  %v993_v35 = vmov 26   ;;  %v994_v36 = vmov 46   ;;  %v995_v37 = vmov 27  }
   0x9   :  { %v996_v38 = vmov 49   ;;  %v997_v39 = vmov 29   ;;  %v998_v40 = vmov 50   ;;  %v999_v41 = vmov 30  }
   0xa   :  { %888 = vset.pattern.permute.xlu1 %v959_v6  ;;  %71 = vperm.xlu0 %887, %v1059_v1   ;;  %v1000_v42 = vmov 53   ;;  %v1001_v43 = vmov 32   ;;  %v1002_v44 = vmov 56   ;;  %v1003_v46 = vmov 33  }
   0xb   :  { %79 = vperm.xlu1 %888, %v1059_v1   ;;  %v1126_v47 = vshrl.u32 %v32_v45, 7  ;;  %v1004_v48 = vmov 57   ;;  %v1005_v49 = vmov 35   ;;  %v1129_v50 = vand.u32 127, %v32_v45 }
   0xc   :  { %v1006_v54 = vmov 60   ;;  %v1007_v61 = vmov 36   ;;  %v1008_v62 = vmov 62  }
   0xd   :  { %v39_v51 = vsub.s32 0, %v1126_v47  ;;  %vm34_vm0 = vcmp.lt.s32.totalorder %v1129_v50, 17  ;;  %vm120_vm1 = vcmp.lt.s32.totalorder %v1129_v50, 16  ;;  %vm205_vm2 = vcmp.lt.s32.totalorder %v1129_v50, 15 }
   0xe   :  { %890 = vset.pattern.permute.xlu0 %v960_v7  ;;  %vm290_vm3 = vcmp.lt.s32.totalorder %v1129_v50, 1  ;;  %vm443_vm4 = vcmp.lt.s32.totalorder %v1129_v50, 127  ;;  %vm528_vm5 = vcmp.lt.s32.totalorder %v1129_v50, 113  ;;  %vm613_vm6 = vcmp.lt.s32.totalorder %v1129_v50, 112 }
   0xf   :  { %889 = vset.pattern.permute.xlu1 %v961_v8  ;;  %99 = vperm.xlu0 %890, %v1059_v1   ;;  %v40_v57 = vrot.slane %v1136_v52, %v39_v51  ;;  %v44_v58 = vrot.slane %v1141_v53, %v39_v51  ;;  %v1011_v51 = vmov 41   ;;  %vm698_vm7 = vcmp.lt.s32.totalorder %v1129_v50, 111 }
  0x10   :  { %89 = vperm.xlu1 %889, %v1059_v1  }
  0x13   :  { %116 = vrot.lane.b32.xlu0 %v1071_v4, %s962_s3 }
  0x14   :  { %891 = vset.pattern.permute.xlu1 %v963_v9  ;;  %893 = vset.pattern.permute.xlu0 %v964_v10  ;;  %v26_v10 = vld [vmem:[%s1340_s1] sm:$0xff] }
  0x15   :  { %109 = vperm.xlu1 %891, %v1059_v1  }
  0x17   :  { %146 = vperm.xlu0 %893, %v1059_v1  }
  0x19   :  { %892 = vset.pattern.permute.xlu1 %v965_v11  ;;  %v27_v11 = vld [vmem:[%s1340_s1 + $0x8] sm:$0xff]  ;;  %s1017_s1 = smov 112  }
  0x1a   :  { %136 = vperm.xlu1 %892, %v1059_v1  }
  0x1b   :  { %896 = vset.pattern.permute.xlu0 %v966_v12 }
  0x1c   :  { %174 = vperm.xlu0 %896, %v1059_v1  }
  0x1e   :  { %118 = vrot.lane.b32.xlu1 %v1064_v2, %s962_s3 }
  0x1f   :  { %894 = vset.pattern.permute.xlu1 %v967_v13 }
  0x20   :  { %899 = vset.pattern.permute.xlu0 %v968_v14 }
  0x21   :  { %221 = vperm.xlu0 %899, %v1059_v1  }
  0x22   :  { %156 = vperm.xlu1 %894, %v1059_v1  }
  0x25   :  { %900 = vset.pattern.permute.xlu0 %v969_v15 }
  0x26   :  { %895 = vset.pattern.permute.xlu1 %v970_v16  ;;  %231 = vperm.xlu0 %900, %v1059_v1  }
  0x27   :  { %164 = vperm.xlu1 %895, %v1059_v1  }
  0x2a   :  { %903 = vset.pattern.permute.xlu0 %v971_v17 }
  0x2b   :  { %897 = vset.pattern.permute.xlu1 %v972_v18  ;;  %259 = vperm.xlu0 %903, %v1059_v1   ;;  %v1009_v18 = vmov 38  }
  0x2c   :  { %184 = vperm.xlu1 %897, %v1059_v1  }
  0x2f   :  { %906 = vset.pattern.permute.xlu0 %v973_v19 }
  0x30   :  { %898 = vset.pattern.permute.xlu1 %v974_v20  ;;  %306 = vperm.xlu0 %906, %v1059_v1  }
  0x31   :  { %194 = vperm.xlu1 %898, %v1059_v1  }
  0x34   :  { %907 = vset.pattern.permute.xlu0 %v975_v21 }
  0x35   :  { %201 = vrot.lane.b32.xlu1 %v1071_v4, %s976_s25  ;;  %316 = vperm.xlu0 %907, %v1059_v1  }
  0x36   :  { %901 = vset.pattern.permute.xlu1 %v977_v22 }
  0x39   :  { %203 = vrot.lane.b32.xlu1 %v1064_v2, %s976_s25  ;;  %910 = vset.pattern.permute.xlu0 %v978_v23 }
  0x3a   :  { %344 = vperm.xlu0 %910, %v1059_v1  }
  0x3d   :  { %241 = vperm.xlu1 %901, %v1059_v1  }
  0x3e   :  { %913 = vset.pattern.permute.xlu0 %v979_v24 }
  0x3f   :  { %374 = vperm.xlu0 %913, %v1059_v1  }
  0x41   :  { %902 = vset.pattern.permute.xlu1 %v980_v25 }
  0x42   :  { %249 = vperm.xlu1 %902, %v1059_v1  }
  0x43   :  { %916 = vset.pattern.permute.xlu0 %v981_v26 }
  0x44   :  { %402 = vperm.xlu0 %916, %v1059_v1  }
  0x46   :  { %904 = vset.pattern.permute.xlu1 %v982_v27 }
  0x47   :  { %269 = vperm.xlu1 %904, %v1059_v1  }
  0x48   :  { %919 = vset.pattern.permute.xlu0 %v983_v28 }
  0x49   :  { %432 = vperm.xlu0 %919, %v1059_v1  }
  0x4b   :  { %905 = vset.pattern.permute.xlu1 %v984_v29 }
  0x4c   :  { %279 = vperm.xlu1 %905, %v1059_v1  }
  0x4d   :  { %441 = vrot.lane.b32.xlu0 %v1064_v2, %s985_s26 }
  0x4e   :  { %922 = vset.pattern.permute.xlu0 %v986_v30 }
  0x50   :  { %286 = vrot.lane.b32.xlu1 %v1071_v4, %s987_s27 }
  0x51   :  { %908 = vset.pattern.permute.xlu1 %v988_v31  ;;  %479 = vperm.xlu0 %922, %v1059_v1  }
  0x54   :  { %288 = vrot.lane.b32.xlu1 %v1064_v2, %s987_s27 }
  0x55   :  { %925 = vset.pattern.permute.xlu0 %v989_v32 }
  0x56   :  { %507 = vperm.xlu0 %925, %v1059_v1  }
  0x58   :  { %326 = vperm.xlu1 %908, %v1059_v1  }
  0x5a   :  { %524 = vrot.lane.b32.xlu0 %v1071_v4, %s990_s28 }
  0x5b   :  { %928 = vset.pattern.permute.xlu0 %v991_v33 }
  0x5c   :  { %909 = vset.pattern.permute.xlu1 %v992_v34  ;;  %v1010_v34 = vmov 39  }
  0x5d   :  { %334 = vperm.xlu1 %909, %v1059_v1  }
  0x5e   :  { %554 = vperm.xlu0 %928, %v1059_v1  }
  0x61   :  { %911 = vset.pattern.permute.xlu1 %v993_v35 }
  0x62   :  { %354 = vperm.xlu1 %911, %v1059_v1   ;;  %931 = vset.pattern.permute.xlu0 %v994_v36 }
  0x63   :  { %582 = vperm.xlu0 %931, %v1059_v1  }
  0x66   :  { %912 = vset.pattern.permute.xlu1 %v995_v37 }
  0x67   :  { %364 = vperm.xlu1 %912, %v1059_v1   ;;  %934 = vset.pattern.permute.xlu0 %v996_v38 }
  0x68   :  { %629 = vperm.xlu0 %934, %v1059_v1  }
  0x6b   :  { %914 = vset.pattern.permute.xlu1 %v997_v39 }
  0x6c   :  { %384 = vperm.xlu1 %914, %v1059_v1   ;;  %935 = vset.pattern.permute.xlu0 %v998_v40 }
  0x6d   :  { %639 = vperm.xlu0 %935, %v1059_v1  }
  0x70   :  { %915 = vset.pattern.permute.xlu1 %v999_v41 }
  0x71   :  { %394 = vperm.xlu1 %915, %v1059_v1   ;;  %938 = vset.pattern.permute.xlu0 %v1000_v42 }
  0x72   :  { %667 = vperm.xlu0 %938, %v1059_v1  }
  0x74   :  { %v31_v55 = vpop.permute.xlu1 %30 }
  0x75   :  { %917 = vset.pattern.permute.xlu1 %v1001_v43 }
  0x76   :  { %412 = vperm.xlu1 %917, %v1059_v1   ;;  %941 = vset.pattern.permute.xlu0 %v1002_v44 }
  0x77   :  { %714 = vperm.xlu0 %941, %v1059_v1  }
  0x7a   :  { %918 = vset.pattern.permute.xlu1 %v1003_v46 }
  0x7b   :  { %422 = vperm.xlu1 %918, %v1059_v1   ;;  %942 = vset.pattern.permute.xlu0 %v1004_v48 }
  0x7c   :  { %724 = vperm.xlu0 %942, %v1059_v1  }
  0x7f   :  { %920 = vset.pattern.permute.xlu1 %v1005_v49 }
  0x80   :  { %459 = vperm.xlu1 %920, %v1059_v1   ;;  %945 = vset.pattern.permute.xlu0 %v1006_v54  ;;  %v125_v54 = vsub.s32 1, %v1126_v47 }
  0x81   :  { %v52_v56 = vpop.permute.xlu0 %51  ;;  %752 = vperm.xlu0 %945, %v1059_v1  }
  0x84   :  { %439 = vrot.lane.b32.xlu1 %v1071_v4, %s985_s26 }
  0x85   :  { %v62_v59 = vpop.permute.xlu1 %61  ;;  %v29_v60 = vpop.permute.xlu0 %28  ;;  %921 = vset.pattern.permute.xlu1 %v1007_v61  ;;  %948 = vset.pattern.permute.xlu0 %v1008_v62 }
  0x86   :  { %v35_v63 = vsel %vm34_vm0, %v29_v60, %v31_v55  ;;  %v36_v0 = vsel %vm34_vm0, %v31_v55, %v29_v60 }
  0x87   :  { %v45_v3 = vmul.f32 %v40_v57, %v36_v0  ;;  %v46_v5 = vmul.f32 %v44_v58, %v35_v63  ;;  %v1012_v63 = vmov 42   ;;  %v126_v0 = vrot.slane %v1136_v52, %v125_v54 }
  0x88   :  { %469 = vperm.xlu1 %921, %v1059_v1  }
  0x89   :  { %v47_v6 = vrot.slane %v45_v3, 5  ;;  %v48_v7 = vrot.slane %v46_v5, 5  ;;  %v58_v8 = vrot.slane %v45_v3, 6  ;;  %v59_v9 = vrot.slane %v46_v5, 6  ;;  %v72_v17 = vpop.permute.xlu0 %71 }
  0x8a   :  { %v80_v12 = vpop.permute.xlu1 %79  ;;  %v68_v15 = vrot.slane %v45_v3, 7  ;;  %v69_v16 = vrot.slane %v46_v5, 7  ;;  %v86_v32 = vrot.slane %v45_v3, 1  ;;  %v87_v33 = vrot.slane %v46_v5, 1 }
  0x8b   :  { %v54_v13 = vmul.f32 %v52_v56, %v47_v6  ;;  %v55_v14 = vmul.f32 %v52_v56, %v48_v7  ;;  %v64_v21 = vmul.f32 %v62_v59, %v58_v8  ;;  %v65_v22 = vmul.f32 %v62_v59, %v59_v9 }
  0x8c   :  { %923 = vset.pattern.permute.xlu1 %v1009_v18  ;;  %v74_v25 = vmul.f32 %v72_v17, %v68_v15  ;;  %v75_v26 = vmul.f32 %v72_v17, %v69_v16  ;;  %v82_v28 = vmul.f32 %v80_v12, %v45_v3  ;;  %v83_v29 = vmul.f32 %v80_v12, %v46_v5 }
  0x8d   :  { %v56_v19 = vadd.f32 %v54_v13, %v26_v10  ;;  %v57_v20 = vadd.f32 %v55_v14, %v27_v11  ;;  %487 = vperm.xlu1 %923, %v1059_v1   ;;  %v96_v35 = vrot.slane %v45_v3, 2  ;;  %v97_v36 = vrot.slane %v46_v5, 2 }
  0x8e   :  { %v100_v37 = vpop.permute.xlu0 %99  ;;  %v106_v43 = vrot.slane %v45_v3, 3  ;;  %v107_v44 = vrot.slane %v46_v5, 3  ;;  %v130_v3 = vrot.slane %v1141_v53, %v125_v54  ;;  %v1013_v16 = vmov 44  }
  0x8f   :  { %v66_v23 = vadd.f32 %v64_v21, %v56_v19  ;;  %v67_v24 = vadd.f32 %v65_v22, %v57_v20  ;;  %v90_v27 = vpop.permute.xlu1 %89  ;;  %v102_v45 = vmul.f32 %v100_v37, %v96_v35  ;;  %v103_v46 = vmul.f32 %v100_v37, %v97_v36 }
  0x90   :  { %v92_v40 = vmul.f32 %v90_v27, %v86_v32  ;;  %v93_v41 = vmul.f32 %v90_v27, %v87_v33  ;;  %v1015_v54 = vmov 47  }
  0x91   :  { %v76_v30 = vadd.f32 %v74_v25, %v66_v23  ;;  %v77_v31 = vadd.f32 %v75_v26, %v67_v24  ;;  %924 = vset.pattern.permute.xlu1 %v1010_v34  ;;  %v1014_v34 = vmov 45  }
  0x92   :  { %497 = vperm.xlu1 %924, %v1059_v1   ;;  %v117_v5 = vpop.permute.xlu0 %116 }
  0x93   :  { %v84_v38 = vadd.f32 %v82_v28, %v76_v30  ;;  %v85_v39 = vadd.f32 %v83_v29, %v77_v31 }
  0x94   :  { %v110_v42 = vpop.permute.xlu1 %109 }
  0x95   :  { %v94_v48 = vadd.f32 %v92_v40, %v84_v38  ;;  %v95_v49 = vadd.f32 %v93_v41, %v85_v39  ;;  %v112_v57 = vmul.f32 %v110_v42, %v106_v43  ;;  %v113_v58 = vmul.f32 %v110_v42, %v107_v44 }
  0x96   :  { %926 = vset.pattern.permute.xlu1 %v1011_v51  ;;  %v147_v17 = vpop.permute.xlu0 %146 }
  0x97   :  { %v104_v55 = vadd.f32 %v102_v45, %v94_v48  ;;  %v105_v56 = vadd.f32 %v103_v46, %v95_v49  ;;  %517 = vperm.xlu1 %926, %v1059_v1  }
  0x99   :  { %v114_v59 = vadd.f32 %v112_v57, %v104_v55  ;;  %v115_v60 = vadd.f32 %v113_v58, %v105_v56  ;;  %v137_v61 = vpop.permute.xlu1 %136  ;;  %v1016_v58 = vmov 48  }
  0x9b   :  { %927 = vset.pattern.permute.xlu1 %v1012_v63  ;;  %v175_v33 = vpop.permute.xlu0 %174  ;;  %v1018_v63 = vmov 51  }
  0x9c   :  { %544 = vperm.xlu1 %927, %v1059_v1  }
  0x9d   :  { %v119_v6 = vpop.permute.xlu1 %118 }
  0x9e   :  { %v121_v7 = vsel %vm120_vm1, %v117_v5, %v119_v6  ;;  %v122_v8 = vsel %vm120_vm1, %v119_v6, %v117_v5 }
  0x9f   :  { %v1165_v9 = vmul.f32 %v126_v0, %v122_v8  ;;  %v1167_v10 = vmul.f32 %v130_v3, %v121_v7 }
  0xa0   :  { %526 = vrot.lane.b32.xlu1 %v1064_v2, %s990_s28 }
  0xa1   :  { %v133_v11 = vrot.slane %v1165_v9, 5  ;;  %v134_v12 = vrot.slane %v1167_v10, 5  ;;  %v143_v13 = vrot.slane %v1165_v9, 6  ;;  %v144_v14 = vrot.slane %v1167_v10, 6  ;;  %v157_v15 = vpop.permute.xlu1 %156  ;;  %929 = vset.pattern.permute.xlu1 %v1013_v16 }
  0xa2   :  { %v153_v20 = vrot.slane %v1165_v9, 7  ;;  %v154_v21 = vrot.slane %v1167_v10, 7  ;;  %v171_v26 = vrot.slane %v1165_v9, 1  ;;  %v172_v27 = vrot.slane %v1167_v10, 1 }
  0xa3   :  { %v139_v18 = vmul.f32 %v137_v61, %v133_v11  ;;  %v140_v19 = vmul.f32 %v137_v61, %v134_v12  ;;  %v149_v24 = vmul.f32 %v147_v17, %v143_v13  ;;  %v150_v25 = vmul.f32 %v147_v17, %v144_v14 }
  0xa4   :  { %564 = vperm.xlu1 %929, %v1059_v1   ;;  %v159_v31 = vmul.f32 %v157_v15, %v153_v20  ;;  %v160_v32 = vmul.f32 %v157_v15, %v154_v21  ;;  %v181_v39 = vrot.slane %v1165_v9, 2  ;;  %v182_v40 = vrot.slane %v1167_v10, 2  ;;  %v222_v20 = vpop.permute.xlu0 %221 }
  0xa5   :  { %v141_v22 = vadd.f32 %v139_v18, %v114_v59  ;;  %v142_v23 = vadd.f32 %v140_v19, %v115_v60  ;;  %v177_v41 = vmul.f32 %v175_v33, %v171_v26  ;;  %v178_v42 = vmul.f32 %v175_v33, %v172_v27 }
  0xa6   :  { %v165_v28 = vpop.permute.xlu1 %164  ;;  %v210_v60 = vsub.s32 2, %v1126_v47  ;;  %v191_v12 = vrot.slane %v1165_v9, 3  ;;  %v192_v13 = vrot.slane %v1167_v10, 3  ;;  %v1019_v19 = vmov 52  }
  0xa7   :  { %v151_v29 = vadd.f32 %v149_v24, %v141_v22  ;;  %v152_v30 = vadd.f32 %v150_v25, %v142_v23  ;;  %v167_v37 = vmul.f32 %v165_v28, %v1165_v9  ;;  %v168_v38 = vmul.f32 %v165_v28, %v1167_v10 }
  0xa8   :  { %930 = vset.pattern.permute.xlu1 %v1014_v34  ;;  %v211_v0 = vrot.slane %v1136_v52, %v210_v60  ;;  %v215_v3 = vrot.slane %v1141_v53, %v210_v60  ;;  %v1020_v26 = vmov 54  }
  0xa9   :  { %v161_v35 = vadd.f32 %v159_v31, %v151_v29  ;;  %v162_v36 = vadd.f32 %v160_v32, %v152_v30  ;;  %572 = vperm.xlu1 %930, %v1059_v1   ;;  %v232_v29 = vpop.permute.xlu0 %231 }
  0xab   :  { %v169_v43 = vadd.f32 %v167_v37, %v161_v35  ;;  %v170_v44 = vadd.f32 %v168_v38, %v162_v36  ;;  %v185_v45 = vpop.permute.xlu1 %184  ;;  %v1021_v37 = vmov 55   ;;  %v295_v38 = vsub.s32 3, %v1126_v47 }
  0xac   :  { %v187_v46 = vmul.f32 %v185_v45, %v181_v39  ;;  %v188_v48 = vmul.f32 %v185_v45, %v182_v40 }
  0xad   :  { %v179_v49 = vadd.f32 %v177_v41, %v169_v43  ;;  %v180_v51 = vadd.f32 %v178_v42, %v170_v44  ;;  %932 = vset.pattern.permute.xlu1 %v1015_v54  ;;  %v296_v44 = vrot.slane %v1136_v52, %v295_v38  ;;  %v300_v45 = vrot.slane %v1141_v53, %v295_v38 }
  0xae   :  { %592 = vperm.xlu1 %932, %v1059_v1  }
  0xaf   :  { %v189_v55 = vadd.f32 %v187_v46, %v179_v49  ;;  %v190_v56 = vadd.f32 %v188_v48, %v180_v51 }
  0xb0   :  { %v195_v57 = vpop.permute.xlu1 %194 }
  0xb1   :  { %v197_v17 = vmul.f32 %v195_v57, %v191_v12  ;;  %v198_v18 = vmul.f32 %v195_v57, %v192_v13 }
  0xb2   :  { %933 = vset.pattern.permute.xlu1 %v1016_v58 }
  0xb3   :  { %602 = vperm.xlu1 %933, %v1059_v1   ;;  %v199_v24 = vadd.f32 %v197_v17, %v189_v55  ;;  %v200_v25 = vadd.f32 %v198_v18, %v190_v56  ;;  %v1023_v55 = vmov 58   ;;  %v260_v56 = vpop.permute.xlu0 %259 }
  0xb4   :  { %v202_v59 = vpop.permute.xlu1 %201 }
  0xb7   :  { %609 = vrot.lane.b32.xlu1 %v1071_v4, %s1017_s1 }
  0xb8   :  { %v204_v61 = vpop.permute.xlu1 %203  ;;  %936 = vset.pattern.permute.xlu1 %v1018_v63 }
  0xb9   :  { %v206_v5 = vsel %vm205_vm2, %v202_v59, %v204_v61  ;;  %v207_v6 = vsel %vm205_vm2, %v204_v61, %v202_v59 }
  0xba   :  { %v1193_v8 = vmul.f32 %v211_v0, %v207_v6  ;;  %v1195_v11 = vmul.f32 %v215_v3, %v206_v5 }
  0xbb   :  { %611 = vrot.lane.b32.xlu1 %v1064_v2, %s1017_s1 }
  0xbc   :  { %v242_v7 = vpop.permute.xlu1 %241  ;;  %v218_v14 = vrot.slane %v1193_v8, 5  ;;  %v219_v15 = vrot.slane %v1195_v11, 5  ;;  %v228_v9 = vrot.slane %v1193_v8, 6  ;;  %v229_v10 = vrot.slane %v1195_v11, 6 }
  0xbd   :  { %v238_v32 = vrot.slane %v1193_v8, 7  ;;  %v239_v33 = vrot.slane %v1195_v11, 7  ;;  %v256_v46 = vrot.slane %v1193_v8, 1  ;;  %v257_v48 = vrot.slane %v1195_v11, 1 }
  0xbe   :  { %v224_v21 = vmul.f32 %v222_v20, %v218_v14  ;;  %v225_v22 = vmul.f32 %v222_v20, %v219_v15  ;;  %v234_v30 = vmul.f32 %v232_v29, %v228_v9  ;;  %v235_v31 = vmul.f32 %v232_v29, %v229_v10 }
  0xbf   :  { %649 = vperm.xlu1 %936, %v1059_v1   ;;  %v244_v39 = vmul.f32 %v242_v7, %v238_v32  ;;  %v245_v40 = vmul.f32 %v242_v7, %v239_v33  ;;  %v266_v0 = vrot.slane %v1193_v8, 2  ;;  %v267_v3 = vrot.slane %v1195_v11, 2 }
  0xc0   :  { %v226_v27 = vadd.f32 %v224_v21, %v199_v24  ;;  %v227_v28 = vadd.f32 %v225_v22, %v200_v25  ;;  %v262_v5 = vmul.f32 %v260_v56, %v256_v46  ;;  %v263_v6 = vmul.f32 %v260_v56, %v257_v48  ;;  %v307_v22 = vpop.permute.xlu0 %306 }
  0xc1   :  { %v250_v16 = vpop.permute.xlu1 %249  ;;  %v276_v14 = vrot.slane %v1193_v8, 3  ;;  %v277_v15 = vrot.slane %v1195_v11, 3 }
  0xc2   :  { %v236_v35 = vadd.f32 %v234_v30, %v226_v27  ;;  %v237_v36 = vadd.f32 %v235_v31, %v227_v28  ;;  %v252_v49 = vmul.f32 %v250_v16, %v1193_v8  ;;  %v253_v51 = vmul.f32 %v250_v16, %v1195_v11 }
  0xc3   :  { %937 = vset.pattern.permute.xlu1 %v1019_v19 }
  0xc4   :  { %657 = vperm.xlu1 %937, %v1059_v1   ;;  %v246_v42 = vadd.f32 %v244_v39, %v236_v35  ;;  %v247_v43 = vadd.f32 %v245_v40, %v237_v36  ;;  %v317_v32 = vpop.permute.xlu0 %316 }
  0xc6   :  { %v270_v23 = vpop.permute.xlu1 %269  ;;  %v254_v59 = vadd.f32 %v252_v49, %v246_v42  ;;  %v255_v60 = vadd.f32 %v253_v51, %v247_v43 }
  0xc7   :  { %v272_v12 = vmul.f32 %v270_v23, %v266_v0  ;;  %v273_v13 = vmul.f32 %v270_v23, %v267_v3 }
  0xc8   :  { %939 = vset.pattern.permute.xlu1 %v1020_v26  ;;  %v264_v16 = vadd.f32 %v262_v5, %v254_v59  ;;  %v265_v17 = vadd.f32 %v263_v6, %v255_v60  ;;  %v1024_v26 = vmov 59  }
  0xc9   :  { %677 = vperm.xlu1 %939, %v1059_v1  }
  0xca   :  { %v274_v25 = vadd.f32 %v272_v12, %v264_v16  ;;  %v275_v9 = vadd.f32 %v273_v13, %v265_v17 }
  0xcb   :  { %v280_v34 = vpop.permute.xlu1 %279 }
  0xcc   :  { %v282_v20 = vmul.f32 %v280_v34, %v276_v14  ;;  %v283_v21 = vmul.f32 %v280_v34, %v277_v15  ;;  %v372_v14 = vrot.slane %v1064_v2, 5  ;;  %v371_v15 = vrot.slane %v1071_v4, 5 }
  0xcd   :  { %940 = vset.pattern.permute.xlu1 %v1021_v37  ;;  %v1025_v37 = vmov 61  }
  0xce   :  { %687 = vperm.xlu1 %940, %v1059_v1   ;;  %v284_v8 = vadd.f32 %v282_v20, %v274_v25  ;;  %v285_v11 = vadd.f32 %v283_v21, %v275_v9  ;;  %v382_v20 = vrot.slane %v1064_v2, 6  ;;  %v392_v25 = vrot.slane %v1064_v2, 7 }
  0xcf   :  { %v287_v41 = vpop.permute.xlu1 %286  ;;  %v391_v9 = vrot.slane %v1071_v4, 7 }
  0xd2   :  { %694 = vrot.lane.b32.xlu1 %v1071_v4, %s1022_s12 }
  0xd3   :  { %v289_v54 = vpop.permute.xlu1 %288  ;;  %943 = vset.pattern.permute.xlu1 %v1023_v55 }
  0xd4   :  { %v291_v57 = vsel %vm290_vm3, %v287_v41, %v289_v54  ;;  %v292_v58 = vsel %vm290_vm3, %v289_v54, %v287_v41  ;;  %v345_v54 = vpop.permute.xlu0 %344 }
  0xd5   :  { %v1222_v61 = vmul.f32 %v296_v44, %v292_v58  ;;  %v1224_v63 = vmul.f32 %v300_v45, %v291_v57 }
  0xd6   :  { %696 = vrot.lane.b32.xlu1 %v1064_v2, %s1022_s12 }
  0xd7   :  { %v327_v7 = vpop.permute.xlu1 %326  ;;  %v303_v18 = vrot.slane %v1222_v61, 5  ;;  %v304_v19 = vrot.slane %v1224_v63, 5  ;;  %v313_v27 = vrot.slane %v1222_v61, 6  ;;  %v314_v28 = vrot.slane %v1224_v63, 6 }
  0xd8   :  { %v323_v35 = vrot.slane %v1222_v61, 7  ;;  %v324_v36 = vrot.slane %v1224_v63, 7  ;;  %v341_v45 = vrot.slane %v1222_v61, 1  ;;  %v342_v46 = vrot.slane %v1224_v63, 1  ;;  %v375_v16 = vpop.permute.xlu0 %374 }
  0xd9   :  { %v309_v10 = vmul.f32 %v307_v22, %v303_v18  ;;  %v310_v23 = vmul.f32 %v307_v22, %v304_v19  ;;  %v319_v33 = vmul.f32 %v317_v32, %v313_v27  ;;  %v320_v34 = vmul.f32 %v317_v32, %v314_v28 }
  0xda   :  { %734 = vperm.xlu1 %943, %v1059_v1   ;;  %v329_v41 = vmul.f32 %v327_v7, %v323_v35  ;;  %v330_v42 = vmul.f32 %v327_v7, %v324_v36  ;;  %v347_v57 = vmul.f32 %v345_v54, %v341_v45  ;;  %v348_v58 = vmul.f32 %v345_v54, %v342_v46 }
  0xdb   :  { %v311_v29 = vadd.f32 %v309_v10, %v284_v8  ;;  %v312_v30 = vadd.f32 %v310_v23, %v285_v11  ;;  %v352_v59 = vrot.slane %v1224_v63, 2  ;;  %v362_v60 = vrot.slane %v1224_v63, 3 }
  0xdc   :  { %v335_v24 = vpop.permute.xlu1 %334  ;;  %v377_v22 = vmul.f32 %v375_v16, %v371_v15  ;;  %v403_v10 = vpop.permute.xlu0 %402  ;;  %v420_v45 = vrot.slane %v1064_v2, 2  ;;  %v419_v46 = vrot.slane %v1071_v4, 2 }
  0xdd   :  { %v321_v38 = vadd.f32 %v319_v33, %v311_v29  ;;  %v322_v39 = vadd.f32 %v320_v34, %v312_v30  ;;  %v337_v48 = vmul.f32 %v335_v24, %v1222_v61  ;;  %v338_v49 = vmul.f32 %v335_v24, %v1224_v63 }
  0xde   :  { %944 = vset.pattern.permute.xlu1 %v1024_v26  ;;  %v378_v24 = vmul.f32 %v375_v16, %v372_v14 }
  0xdf   :  { %742 = vperm.xlu1 %944, %v1059_v1   ;;  %v331_v43 = vadd.f32 %v329_v41, %v321_v38  ;;  %v332_v44 = vadd.f32 %v330_v42, %v322_v39  ;;  %v406_v38 = vmul.f32 %v403_v10, %v1064_v2  ;;  %v410_v39 = vrot.slane %v1064_v2, 1 }
  0xe0   :  { %v433_v30 = vpop.permute.xlu0 %432 }
  0xe1   :  { %v355_v31 = vpop.permute.xlu1 %354  ;;  %v339_v55 = vadd.f32 %v337_v48, %v331_v43  ;;  %v340_v56 = vadd.f32 %v338_v49, %v332_v44 }
  0xe2   :  { %v358_v7 = vmul.f32 %v355_v31, %v352_v59 }
  0xe3   :  { %946 = vset.pattern.permute.xlu1 %v1025_v37  ;;  %v349_v3 = vadd.f32 %v347_v57, %v339_v55  ;;  %v350_v5 = vadd.f32 %v348_v58, %v340_v56  ;;  %v405_v37 = vmul.f32 %v403_v10, %v1071_v4 }
  0xe4   :  { %762 = vperm.xlu1 %946, %v1059_v1   ;;  %v442_v43 = vpop.permute.xlu0 %441 }
  0xe5   :  { %v360_v18 = vadd.f32 %v358_v7, %v350_v5 }
  0xe6   :  { %v365_v40 = vpop.permute.xlu1 %364 }
  0xe7   :  { %v368_v13 = vmul.f32 %v365_v40, %v362_v60  ;;  %v430_v60 = vrot.slane %v1064_v2, 3 }
  0xe8   :  { %947 = vset.pattern.permute.xlu1 %v1008_v62  ;;  %v351_v62 = vrot.slane %v1222_v61, 2  ;;  %v480_v10 = vpop.permute.xlu0 %479 }
  0xe9   :  { %772 = vperm.xlu1 %947, %v1059_v1   ;;  %v361_v1 = vrot.slane %v1222_v61, 3  ;;  %v381_v61 = vrot.slane %v1071_v4, 6  ;;  %v370_v21 = vadd.f32 %v368_v13, %v360_v18  ;;  %v436_v15 = vmul.f32 %v433_v30, %v430_v60 }
  0xea   :  { %v357_v6 = vmul.f32 %v355_v31, %v351_v62  ;;  %v448_v31 = vsub.s32 5, %v1126_v47 }
  0xeb   :  { %v385_v51 = vpop.permute.xlu1 %384  ;;  %v367_v12 = vmul.f32 %v365_v40, %v361_v1  ;;  %v380_v8 = vadd.f32 %v378_v24, %v370_v21  ;;  %v409_v40 = vrot.slane %v1071_v4, 1 }
  0xec   :  { %v359_v17 = vadd.f32 %v357_v6, %v349_v3  ;;  %v387_v11 = vmul.f32 %v385_v51, %v381_v61  ;;  %v388_v27 = vmul.f32 %v385_v51, %v382_v20  ;;  %v449_v41 = vrot.slane %v1136_v52, %v448_v31 }
  0xed   :  { %v453_v42 = vrot.slane %v1141_v53, %v448_v31  ;;  %v508_v31 = vpop.permute.xlu0 %507 }
  0xee   :  { %v369_v63 = vadd.f32 %v367_v12, %v359_v17  ;;  %v390_v33 = vadd.f32 %v388_v27, %v380_v8 }
  0xf0   :  { %v395_v0 = vpop.permute.xlu1 %394  ;;  %v379_v26 = vadd.f32 %v377_v22, %v369_v63 }
  0xf1   :  { %v397_v28 = vmul.f32 %v395_v0, %v391_v9  ;;  %v398_v29 = vmul.f32 %v395_v0, %v392_v25  ;;  %v429_v0 = vrot.slane %v1071_v4, 3 }
  0xf2   :  { %v389_v32 = vadd.f32 %v387_v11, %v379_v26 }
  0xf3   :  { %v400_v36 = vadd.f32 %v398_v29, %v390_v33  ;;  %v435_v14 = vmul.f32 %v433_v30, %v429_v0 }
  0xf4   :  { %v399_v35 = vadd.f32 %v397_v28, %v389_v32  ;;  %v533_v28 = vsub.s32 6, %v1126_v47 }
  0xf5   :  { %v413_v19 = vpop.permute.xlu1 %412  ;;  %v408_v54 = vadd.f32 %v406_v38, %v400_v36 }
  0xf6   :  { %v407_v51 = vadd.f32 %v405_v37, %v399_v35  ;;  %v415_v55 = vmul.f32 %v413_v19, %v409_v40  ;;  %v416_v56 = vmul.f32 %v413_v19, %v410_v39  ;;  %v534_v37 = vrot.slane %v1136_v52, %v533_v28 }
  0xf7   :  { %v538_v38 = vrot.slane %v1141_v53, %v533_v28 }
  0xf8   :  { %v417_v3 = vadd.f32 %v415_v55, %v407_v51  ;;  %v418_v5 = vadd.f32 %v416_v56, %v408_v54 }
  0xfa   :  { %v423_v23 = vpop.permute.xlu1 %422 }
  0xfb   :  { %v425_v59 = vmul.f32 %v423_v23, %v419_v46  ;;  %v426_v1 = vmul.f32 %v423_v23, %v420_v45  ;;  %v525_v45 = vpop.permute.xlu0 %524 }
  0xfd   :  { %v427_v12 = vadd.f32 %v425_v59, %v417_v3  ;;  %v428_v13 = vadd.f32 %v426_v1, %v418_v5 }
  0xff   :  { %v460_v34 = vpop.permute.xlu1 %459  ;;  %v437_v19 = vadd.f32 %v435_v14, %v427_v12  ;;  %v438_v20 = vadd.f32 %v436_v15, %v428_v13 }
 0x103   :  { %v440_v44 = vpop.permute.xlu1 %439 }
 0x104   :  { %v444_v48 = vsel %vm443_vm4, %v440_v44, %v442_v43  ;;  %v445_v49 = vsel %vm443_vm4, %v442_v43, %v440_v44 }
 0x105   :  { %v1266_v57 = vmul.f32 %v449_v41, %v444_v48  ;;  %v1268_v58 = vmul.f32 %v453_v42, %v445_v49 }
 0x107   :  { %v470_v62 = vpop.permute.xlu1 %469  ;;  %v456_v6 = vrot.slane %v1266_v57, 5  ;;  %v457_v7 = vrot.slane %v1268_v58, 5  ;;  %v466_v61 = vrot.slane %v1266_v57, 6  ;;  %v467_v2 = vrot.slane %v1268_v58, 6 }
 0x108   :  { %v476_v22 = vrot.slane %v1266_v57, 7  ;;  %v477_v24 = vrot.slane %v1268_v58, 7  ;;  %v494_v35 = vrot.slane %v1266_v57, 1  ;;  %v495_v36 = vrot.slane %v1268_v58, 1 }
 0x109   :  { %v462_v17 = vmul.f32 %v460_v34, %v456_v6  ;;  %v463_v18 = vmul.f32 %v460_v34, %v457_v7  ;;  %v472_v25 = vmul.f32 %v470_v62, %v466_v61  ;;  %v473_v9 = vmul.f32 %v470_v62, %v467_v2 }
 0x10a   :  { %v482_v11 = vmul.f32 %v480_v10, %v476_v22  ;;  %v483_v27 = vmul.f32 %v480_v10, %v477_v24  ;;  %v504_v43 = vrot.slane %v1266_v57, 2  ;;  %v505_v44 = vrot.slane %v1268_v58, 2 }
 0x10b   :  { %v464_v63 = vadd.f32 %v462_v17, %v437_v19  ;;  %v465_v21 = vadd.f32 %v463_v18, %v438_v20  ;;  %v514_v60 = vrot.slane %v1266_v57, 3  ;;  %v515_v0 = vrot.slane %v1268_v58, 3 }
 0x10c   :  { %v488_v16 = vpop.permute.xlu1 %487  ;;  %v510_v62 = vmul.f32 %v508_v31, %v504_v43  ;;  %v511_v59 = vmul.f32 %v508_v31, %v505_v44 }
 0x10d   :  { %v474_v23 = vadd.f32 %v472_v25, %v464_v63  ;;  %v475_v26 = vadd.f32 %v473_v9, %v465_v21  ;;  %v490_v33 = vmul.f32 %v488_v16, %v1266_v57  ;;  %v491_v34 = vmul.f32 %v488_v16, %v1268_v58  ;;  %v555_v58 = vpop.permute.xlu0 %554 }
 0x10f   :  { %v484_v29 = vadd.f32 %v482_v11, %v474_v23  ;;  %v485_v30 = vadd.f32 %v483_v27, %v475_v26  ;;  %v618_v11 = vsub.s32 7, %v1126_v47 }
 0x111   :  { %v498_v4 = vpop.permute.xlu1 %497  ;;  %v492_v39 = vadd.f32 %v490_v33, %v484_v29  ;;  %v493_v40 = vadd.f32 %v491_v34, %v485_v30 }
 0x112   :  { %v500_v41 = vmul.f32 %v498_v4, %v494_v35  ;;  %v501_v42 = vmul.f32 %v498_v4, %v495_v36  ;;  %v619_v35 = vrot.slane %v1136_v52, %v618_v11  ;;  %v623_v36 = vrot.slane %v1141_v53, %v618_v11 }
 0x114   :  { %v502_v55 = vadd.f32 %v500_v41, %v492_v39  ;;  %v503_v56 = vadd.f32 %v501_v42, %v493_v40 }
 0x116   :  { %v518_v8 = vpop.permute.xlu1 %517  ;;  %v512_v6 = vadd.f32 %v510_v62, %v502_v55  ;;  %v513_v7 = vadd.f32 %v511_v59, %v503_v56 }
 0x117   :  { %v520_v12 = vmul.f32 %v518_v8, %v514_v60  ;;  %v521_v13 = vmul.f32 %v518_v8, %v515_v0 }
 0x119   :  { %v522_v17 = vadd.f32 %v520_v12, %v512_v6  ;;  %v523_v18 = vadd.f32 %v521_v13, %v513_v7 }
 0x11b   :  { %v545_v32 = vpop.permute.xlu1 %544 }
 0x11f   :  { %v527_v46 = vpop.permute.xlu1 %526 }
 0x120   :  { %v529_v48 = vsel %vm528_vm5, %v525_v45, %v527_v46  ;;  %v530_v49 = vsel %vm528_vm5, %v527_v46, %v525_v45 }
 0x121   :  { %v1288_v51 = vmul.f32 %v534_v37, %v529_v48  ;;  %v1290_v54 = vmul.f32 %v538_v38, %v530_v49 }
 0x123   :  { %v565_v1 = vpop.permute.xlu1 %564  ;;  %v541_v3 = vrot.slane %v1288_v51, 5  ;;  %v542_v5 = vrot.slane %v1290_v54, 5  ;;  %v551_v19 = vrot.slane %v1288_v51, 6  ;;  %v552_v20 = vrot.slane %v1290_v54, 6 }
 0x124   :  { %v561_v21 = vrot.slane %v1288_v51, 7  ;;  %v562_v22 = vrot.slane %v1290_v54, 7  ;;  %v579_v27 = vrot.slane %v1288_v51, 1  ;;  %v580_v28 = vrot.slane %v1290_v54, 1 }
 0x125   :  { %v547_v14 = vmul.f32 %v545_v32, %v541_v3  ;;  %v548_v15 = vmul.f32 %v545_v32, %v542_v5  ;;  %v557_v4 = vmul.f32 %v555_v58, %v551_v19  ;;  %v558_v63 = vmul.f32 %v555_v58, %v552_v20  ;;  %v583_v32 = vpop.permute.xlu0 %582 }
 0x126   :  { %v567_v9 = vmul.f32 %v565_v1, %v561_v21  ;;  %v568_v10 = vmul.f32 %v565_v1, %v562_v22  ;;  %v589_v47 = vrot.slane %v1288_v51, 2  ;;  %v590_v37 = vrot.slane %v1290_v54, 2 }
 0x127   :  { %v550_v57 = vadd.f32 %v548_v15, %v523_v18  ;;  %v549_v61 = vadd.f32 %v547_v14, %v522_v17  ;;  %v585_v38 = vmul.f32 %v583_v32, %v579_v27  ;;  %v586_v39 = vmul.f32 %v583_v32, %v580_v28 }
 0x128   :  { %v573_v16 = vpop.permute.xlu1 %572  ;;  %v599_v40 = vrot.slane %v1288_v51, 3  ;;  %v600_v41 = vrot.slane %v1290_v54, 3 }
 0x129   :  { %v559_v24 = vadd.f32 %v557_v4, %v549_v61  ;;  %v560_v25 = vadd.f32 %v558_v63, %v550_v57  ;;  %v575_v29 = vmul.f32 %v573_v16, %v1288_v51  ;;  %v576_v30 = vmul.f32 %v573_v16, %v1290_v54  ;;  %v630_v60 = vpop.permute.xlu0 %629 }
 0x12b   :  { %v569_v26 = vadd.f32 %v567_v9, %v559_v24  ;;  %v570_v8 = vadd.f32 %v568_v10, %v560_v25 }
 0x12d   :  { %v593_v2 = vpop.permute.xlu1 %592  ;;  %v577_v33 = vadd.f32 %v575_v29, %v569_v26  ;;  %v578_v34 = vadd.f32 %v576_v30, %v570_v8  ;;  %v640_v16 = vpop.permute.xlu0 %639 }
 0x12e   :  { %v595_v43 = vmul.f32 %v593_v2, %v589_v47  ;;  %v596_v44 = vmul.f32 %v593_v2, %v590_v37  ;;  %v810_v37 = vld [vmem:[%s1339_s2 + $0x10] ss:$0 sm:$0xff] }
 0x12f   :  { %v587_v48 = vadd.f32 %v585_v38, %v577_v33  ;;  %v588_v49 = vadd.f32 %v586_v39, %v578_v34  ;;  %v811_v38 = vld [vmem:[%s1339_s2 + $0x18] ss:$0 sm:$0xff] }
 0x131   :  { %v597_v0 = vadd.f32 %v595_v43, %v587_v48  ;;  %v598_v3 = vadd.f32 %v596_v44, %v588_v49 }
 0x132   :  { %v603_v23 = vpop.permute.xlu1 %602 }
 0x133   :  { %v605_v53 = vmul.f32 %v603_v23, %v599_v40  ;;  %v606_v56 = vmul.f32 %v603_v23, %v600_v41  ;;  %v668_v23 = vpop.permute.xlu0 %667 }
 0x135   :  { %v607_v54 = vadd.f32 %v605_v53, %v597_v0  ;;  %v608_v6 = vadd.f32 %v606_v56, %v598_v3 }
 0x136   :  { %v610_v31 = vpop.permute.xlu1 %609 }
 0x137   :  { %v715_v33 = vpop.permute.xlu0 %714 }
 0x13a   :  { %v612_v42 = vpop.permute.xlu1 %611 }
 0x13b   :  { %v614_v45 = vsel %vm613_vm6, %v610_v31, %v612_v42  ;;  %v615_v46 = vsel %vm613_vm6, %v612_v42, %v610_v31  ;;  %v725_v53 = vpop.permute.xlu0 %724 }
 0x13c   :  { %v624_v52 = vmul.f32 %v619_v35, %v614_v45  ;;  %v625_v55 = vmul.f32 %v623_v36, %v615_v46 }
 0x13e   :  { %v626_v62 = vrot.slane %v624_v52, 5  ;;  %v627_v59 = vrot.slane %v625_v55, 5  ;;  %v650_v1 = vpop.permute.xlu1 %649  ;;  %v636_v7 = vrot.slane %v624_v52, 6  ;;  %v637_v12 = vrot.slane %v625_v55, 6 }
 0x13f   :  { %v646_v19 = vrot.slane %v624_v52, 7  ;;  %v647_v20 = vrot.slane %v625_v55, 7  ;;  %v664_v24 = vrot.slane %v624_v52, 1  ;;  %v665_v25 = vrot.slane %v625_v55, 1 }
 0x140   :  { %v632_v51 = vmul.f32 %v630_v60, %v626_v62  ;;  %v633_v5 = vmul.f32 %v630_v60, %v627_v59  ;;  %v642_v17 = vmul.f32 %v640_v16, %v636_v7  ;;  %v643_v18 = vmul.f32 %v640_v16, %v637_v12 }
 0x141   :  { %v652_v2 = vmul.f32 %v650_v1, %v646_v19  ;;  %v653_v4 = vmul.f32 %v650_v1, %v647_v20  ;;  %v670_v27 = vmul.f32 %v668_v23, %v664_v24  ;;  %v671_v28 = vmul.f32 %v668_v23, %v665_v25 }
 0x142   :  { %v635_v14 = vadd.f32 %v633_v5, %v608_v6  ;;  %v634_v15 = vadd.f32 %v632_v51, %v607_v54  ;;  %v674_v29 = vrot.slane %v624_v52, 2  ;;  %v675_v30 = vrot.slane %v625_v55, 2 }
 0x143   :  { %v658_v13 = vpop.permute.xlu1 %657  ;;  %v684_v31 = vrot.slane %v624_v52, 3  ;;  %v685_v32 = vrot.slane %v625_v55, 3 }
 0x144   :  { %v644_v57 = vadd.f32 %v642_v17, %v634_v15  ;;  %v645_v61 = vadd.f32 %v643_v18, %v635_v14  ;;  %v660_v9 = vmul.f32 %v658_v13, %v624_v52  ;;  %v661_v10 = vmul.f32 %v658_v13, %v625_v55  ;;  %v753_v18 = vpop.permute.xlu0 %752 }
 0x146   :  { %v654_v63 = vadd.f32 %v652_v2, %v644_v57  ;;  %v655_v21 = vadd.f32 %v653_v4, %v645_v61 }
 0x148   :  { %v678_v58 = vpop.permute.xlu1 %677  ;;  %v662_v26 = vadd.f32 %v660_v9, %v654_v63  ;;  %v663_v8 = vadd.f32 %v661_v10, %v655_v21 }
 0x149   :  { %v680_v36 = vmul.f32 %v678_v58, %v674_v29  ;;  %v681_v47 = vmul.f32 %v678_v58, %v675_v30 }
 0x14a   :  { %v672_v34 = vadd.f32 %v670_v27, %v662_v26  ;;  %v673_v35 = vadd.f32 %v671_v28, %v663_v8 }
 0x14c   :  { %v682_v50 = vadd.f32 %v680_v36, %v672_v34  ;;  %v683_v46 = vadd.f32 %v681_v47, %v673_v35 }
 0x14d   :  { %v688_v22 = vpop.permute.xlu1 %687 }
 0x14e   :  { %v690_v40 = vmul.f32 %v688_v22, %v684_v31  ;;  %v691_v41 = vmul.f32 %v688_v22, %v685_v32 }
 0x150   :  { %v692_v62 = vadd.f32 %v690_v40, %v682_v50  ;;  %v693_v59 = vadd.f32 %v691_v41, %v683_v46  ;;  %v953_v46 = vld [vmem:[%s1338_s0] sm:$0xff] }
 0x151   :  { %v695_v11 = vpop.permute.xlu1 %694 }
 0x155   :  { %v697_v39 = vpop.permute.xlu1 %696 }
 0x156   :  { %v699_v42 = vsel %vm698_vm7, %v695_v11, %v697_v39  ;;  %v700_v43 = vsel %vm698_vm7, %v697_v39, %v695_v11 }
 0x157   :  { %v709_v44 = vmul.f32 %v810_v37, %v699_v42  ;;  %v710_v45 = vmul.f32 %v811_v38, %v700_v43 }
 0x159   :  { %v711_v48 = vrot.slane %v709_v44, 5  ;;  %v712_v49 = vrot.slane %v710_v45, 5  ;;  %v721_v52 = vrot.slane %v709_v44, 6  ;;  %v722_v55 = vrot.slane %v710_v45, 6  ;;  %v735_v56 = vpop.permute.xlu1 %734 }
 0x15a   :  { %v731_v0 = vrot.slane %v709_v44, 7  ;;  %v732_v3 = vrot.slane %v710_v45, 7  ;;  %v749_v7 = vrot.slane %v709_v44, 1  ;;  %v750_v12 = vrot.slane %v710_v45, 1 }
 0x15b   :  { %v717_v1 = vmul.f32 %v715_v33, %v711_v48  ;;  %v718_v60 = vmul.f32 %v715_v33, %v712_v49  ;;  %v727_v54 = vmul.f32 %v725_v53, %v721_v52  ;;  %v728_v6 = vmul.f32 %v725_v53, %v722_v55  ;;  %v954_v49 = vld [vmem:[%s1338_s0 + $0x8] sm:$0xff] }
 0x15c   :  { %v737_v16 = vmul.f32 %v735_v56, %v731_v0  ;;  %v738_v17 = vmul.f32 %v735_v56, %v732_v3  ;;  %v755_v58 = vmul.f32 %v753_v18, %v749_v7  ;;  %v756_v2 = vmul.f32 %v753_v18, %v750_v12 }
 0x15d   :  { %v720_v51 = vadd.f32 %v718_v60, %v693_v59  ;;  %v719_v5 = vadd.f32 %v717_v1, %v692_v62  ;;  %v759_v21 = vrot.slane %v709_v44, 2  ;;  %v760_v22 = vrot.slane %v710_v45, 2 }
 0x15e   :  { %v743_v13 = vpop.permute.xlu1 %742  ;;  %v769_v26 = vrot.slane %v709_v44, 3  ;;  %v770_v8 = vrot.slane %v710_v45, 3 }
 0x15f   :  { %v729_v14 = vadd.f32 %v727_v54, %v719_v5  ;;  %v730_v15 = vadd.f32 %v728_v6, %v720_v51  ;;  %v745_v57 = vmul.f32 %v743_v13, %v709_v44  ;;  %v746_v61 = vmul.f32 %v743_v13, %v710_v45 }
 0x161   :  { %v739_v19 = vadd.f32 %v737_v16, %v729_v14  ;;  %v740_v20 = vadd.f32 %v738_v17, %v730_v15 }
 0x163   :  { %v747_v4 = vadd.f32 %v745_v57, %v739_v19  ;;  %v748_v63 = vadd.f32 %v746_v61, %v740_v20  ;;  %v763_v24 = vpop.permute.xlu1 %762 }
 0x164   :  { %v765_v10 = vmul.f32 %v763_v24, %v759_v21  ;;  %v766_v23 = vmul.f32 %v763_v24, %v760_v22 }
 0x165   :  { %v757_v25 = vadd.f32 %v755_v58, %v747_v4  ;;  %v758_v9 = vadd.f32 %v756_v2, %v748_v63 }
 0x167   :  { %v767_v27 = vadd.f32 %v765_v10, %v757_v25  ;;  %v768_v28 = vadd.f32 %v766_v23, %v758_v9 }
 0x168   :  { %v773_v11 = vpop.permute.xlu1 %772 }
 0x169   :  { %v775_v29 = vmul.f32 %v773_v11, %v769_v26  ;;  %v776_v30 = vmul.f32 %v773_v11, %v770_v8 }
 0x16b   :  { %v777_v31 = vadd.f32 %v775_v29, %v767_v27  ;;  %v778_v32 = vadd.f32 %v776_v30, %v768_v28 }
 0x16d   :  { %v779_v33 = vmax.f32 %v777_v31, %v778_v32 }
 0x16f   :  { %780 = vmax.xlane.f32.xlu0 %v779_v33 }
 0x1fc   :  { %v781_v34 = vpop.xlane.xlu0 %780 }
 0x1fd   :  { %v782_v35 = vrot.slane %v781_v34, 4 }
 0x1ff   :  { %v783_v36 = vmax.f32 %v781_v34, %v782_v35 }
 0x201   :  { %v784_v47 = vrot.slane %v783_v36, 2 }
 0x203   :  { %v785_v37 = vmax.f32 %v783_v36, %v784_v47 }
 0x205   :  { %v786_v38 = vrot.slane %v785_v37, 1 }
 0x207   :  { %v787_v39 = vmax.f32 %v785_v37, %v786_v38 }
 0x209   :  { %812 = vpush %v787_v39 }
 0x23a   :  { %s813_s2 = spop %812 }
 0x23b   :  { %v789_v40 = vstv %s813_s2 }
 0x23c   :  { %v790_v41 = vsub.f32 %v777_v31, %v789_v40  ;;  %v791_v42 = vsub.f32 %v778_v32, %v789_v40 }
 0x23e   :  { %v792_v43 = vmul.f32 1.442695, %v790_v41  ;;  %v794_v44 = vmul.f32 1.442695, %v791_v42 }
 0x240   :  { %949 = vpow2.f32 %v792_v43 }
 0x241   :  { %951 = vpow2.f32 %v794_v44 }
 0x24a   :  { %v950_v45 = vpop.eup %949 }
 0x24b   :  { %v952_v50 = vpop.eup %951  ;;  %796 = vst [vmem:[%s1341_s5] sm:$0xff] %v950_v45  ;;  %v798_v48 = vmul.f32 %v953_v46, %v950_v45 }
 0x24c   :  { %797 = vst [vmem:[%s1341_s5 + $0x8] sm:$0xff] %v952_v50  ;;  %v799_v52 = vmul.f32 %v954_v49, %v952_v50 }
 0x24d   :  { %800 = vst [vmem:[%s1342_s4] sm:$0xff] %v798_v48 }
 0x24e   :  { %801 = vst [vmem:[%s1342_s4 + $0x8] sm:$0xff] %v799_v52 }

</bundles_post_ra>
